<compile_context>
chip_gen: v7x
topology: tpu7x:2x2x1
jax: 0.10.0
libtpu: 0.0.40
codegen_flags: <defaults>
</compile_context>

<pallas_src>
import numpy as np
import jax
import jax.numpy as jnp
from jax.experimental import pallas as pl
from jax.experimental.pallas import tpu as pltpu


LANE = 128
NUM_ROWS = 8                  # batch rows padded to a full sublane tile
IN_CHW = (1, 16, 16)
IN_FEATS = 1 * 16 * 16        # 256
OUT_CHW = (1, 4, 4)
OUT_FEATS = 1 * 4 * 4         # 16
OUT_PAD = 128


def _round_up(x, m):
    return (x + m - 1) // m * m


# ---------------------------------------------------------------------------
# One-time (init) host-side operator construction
# ---------------------------------------------------------------------------
def conv_operator(w, b, Cin, Hin, Win, stride, pad):
    """Dense matrix M (Fin_pad, Fout_pad) + bias (1, Fout_pad) for a Conv2d."""
    w = np.asarray(w, np.float32)
    b = np.asarray(b, np.float32)
    Cout, Cin_w, kh, kw = w.shape
    assert Cin_w == Cin
    Hout = (Hin + 2 * pad - kh) // stride + 1
    Wout = (Win + 2 * pad - kw) // stride + 1
    Fi, Fo = Cin * Hin * Win, Cout * Hout * Wout
    Fip, Fop = _round_up(Fi, LANE), _round_up(Fo, LANE)
    M = np.zeros((Fip, Fop), np.float32)
    for co in range(Cout):
        for ci in range(Cin):
            for i in range(kh):
                for j in range(kw):
                    wij = w[co, ci, i, j]
                    for ho in range(Hout):
                        hi = ho * stride + i - pad
                        if hi < 0 or hi >= Hin:
                            continue                      # zero padding
                        for wo in range(Wout):
                            wi = wo * stride + j - pad
                            if wi < 0 or wi >= Win:
                                continue                  # zero padding
                            M[(ci * Hin + hi) * Win + wi,
                              (co * Hout + ho) * Wout + wo] += wij
    bias = np.zeros((1, Fop), np.float32)
    bias[0, :Fo] = np.repeat(b, Hout * Wout)
    return M, bias, (Cout, Hout, Wout)


def deconv_operator(w, b, Cin, Hin, Win, stride, pad, out_pad):
    """Dense matrix + bias for a ConvTranspose2d (PyTorch semantics)."""
    w = np.asarray(w, np.float32)
    b = np.asarray(b, np.float32)
    Cin_w, Cout, kh, kw = w.shape
    assert Cin_w == Cin
    Hout = (Hin - 1) * stride - 2 * pad + kh + out_pad
    Wout = (Win - 1) * stride - 2 * pad + kw + out_pad
    Fi, Fo = Cin * Hin * Win, Cout * Hout * Wout
    Fip, Fop = _round_up(Fi, LANE), _round_up(Fo, LANE)
    M = np.zeros((Fip, Fop), np.float32)
    for ci in range(Cin):
        for co in range(Cout):
            for i in range(kh):
                for j in range(kw):
                    wij = w[ci, co, i, j]
                    for hi in range(Hin):
                        ho = hi * stride + i - pad
                        if ho < 0 or ho >= Hout:
                            continue
                        for wi in range(Win):
                            wo = wi * stride + j - pad
                            if wo < 0 or wo >= Wout:
                                continue
                            M[(ci * Hin + hi) * Win + wi,
                              (co * Hout + ho) * Wout + wo] += wij
    bias = np.zeros((1, Fop), np.float32)
    bias[0, :Fo] = np.repeat(b, Hout * Wout)
    return M, bias, (Cout, Hout, Wout)


def pool_operator(C, Hin, Win, k, stride, pad):
    """0/1 tap-selection matrix S (Fin_pad, k*k*Fout_pad) for MaxPool2d.

    Out-of-range (padded) taps select 0 — exact here because both pools run on
    post-ReLU data (>= 0) and every window contains at least one real element,
    so 0 can never beat the true -inf-padded max.
    """
    Hout = (Hin + 2 * pad - k) // stride + 1
    Wout = (Win + 2 * pad - k) // stride + 1
    Fi, Fo = C * Hin * Win, C * Hout * Wout
    Fip, Fop = _round_up(Fi, LANE), _round_up(Fo, LANE)
    S = np.zeros((Fip, k * k * Fop), np.float32)
    for c in range(C):
        for i in range(k):
            for j in range(k):
                t = i * k + j
                for ho in range(Hout):
                    hi = ho * stride + i - pad
                    if hi < 0 or hi >= Hin:
                        continue
                    for wo in range(Wout):
                        wi = wo * stride + j - pad
                        if wi < 0 or wi >= Win:
                            continue
                        S[(c * Hin + hi) * Win + wi,
                          t * Fop + (c * Hout + ho) * Wout + wo] = 1.0
    return S, (C, Hout, Wout)


# ---------------------------------------------------------------------------
# Parameters
# ---------------------------------------------------------------------------
def init_raw_params(key):
    """Deterministic PyTorch-shaped weights (Conv/ConvTranspose default init)."""
    def conv_param(k, cout, cin, kh, kw):
        k1, k2 = jax.random.split(k)
        bound = 1.0 / float(cin * kh * kw) ** 0.5
        w = jax.random.uniform(k1, (cout, cin, kh, kw), jnp.float32, -bound, bound)
        b = jax.random.uniform(k2, (cout,), jnp.float32, -bound, bound)
        return w, b

    def deconv_param(k, cin, cout, kh, kw):
        k1, k2 = jax.random.split(k)
        bound = 1.0 / float(cout * kh * kw) ** 0.5
        w = jax.random.uniform(k1, (cin, cout, kh, kw), jnp.float32, -bound, bound)
        b = jax.random.uniform(k2, (cout,), jnp.float32, -bound, bound)
        return w, b

    ks = jax.random.split(key, 9)
    return {
        "conv1":   conv_param(ks[0], 8, 1, 3, 3),
        "conv2":   conv_param(ks[1], 16, 8, 3, 3),
        "conv3":   conv_param(ks[2], 8, 16, 3, 3),
        "conv4":   conv_param(ks[3], 4, 8, 3, 3),
        "deconv5": deconv_param(ks[4], 4, 8, 3, 3),
        "deconv4": deconv_param(ks[5], 8, 16, 3, 3),
        "deconv3": deconv_param(ks[6], 16, 8, 3, 3),
        "deconv2": deconv_param(ks[7], 8, 1, 3, 3),
        "deconv1": deconv_param(ks[8], 8, 1, 3, 3),   # defined but unusable (see TODO)
    }


def build_fused_operands(raw):
    """One-time host preprocessing into lane-padded bf16 matmul operands."""
    C, H, W = IN_CHW
    M1, b1, (C, H, W) = conv_operator(*raw["conv1"], C, H, W, stride=3, pad=1)
    S1, (C, H, W) = pool_operator(C, H, W, k=2, stride=2, pad=1)
    M2, b2, (C, H, W) = conv_operator(*raw["conv2"], C, H, W, stride=2, pad=1)
    S2, (C, H, W) = pool_operator(C, H, W, k=2, stride=2, pad=0)
    M3, b3, (C, H, W) = conv_operator(*raw["conv3"], C, H, W, stride=2, pad=1)
    M4, b4, (C, H, W) = conv_operator(*raw["conv4"], C, H, W, stride=1, pad=1)
    M5, b5, (C, H, W) = deconv_operator(*raw["deconv5"], C, H, W, stride=1, pad=1, out_pad=0)
    M6, b6, (C, H, W) = deconv_operator(*raw["deconv4"], C, H, W, stride=2, pad=1, out_pad=1)
    M7, b7, (C, H, W) = deconv_operator(*raw["deconv3"], C, H, W, stride=3, pad=1, out_pad=0)
    M8, b8, (C, H, W) = deconv_operator(*raw["deconv2"], C, H, W, stride=1, pad=1, out_pad=0)
    # TODO(synk): pool3/4/5, conv5, fc1, embedlayer, unembedlayer, fc6 and
    #             unpool1..5 are used in forward() but never defined in __init__,
    #             and deconv1 expects 8 input channels while deconv2 emits 1;
    #             the reference module cannot run them, so they are skipped.

    assert M1.shape[0] == IN_FEATS and (C, H, W) == OUT_CHW
    tail_M = np.stack([M3, M4, M5, M6, M7, M8])   # (6, 128, 128)
    tail_b = np.stack([b3, b4, b5, b6, b7, b8])   # (6, 1, 128)
    bf16 = lambda a: jnp.asarray(a, jnp.bfloat16)
    f32 = lambda a: jnp.asarray(a, jnp.float32)
    return {"M1": bf16(M1), "b1": f32(b1), "S1": bf16(S1),
            "M2": bf16(M2), "b2": f32(b2), "S2": bf16(S2),
            "Mt": bf16(tail_M), "bt": f32(tail_b)}


# ---------------------------------------------------------------------------
# The single fused Pallas kernel
# ---------------------------------------------------------------------------
def _convnet_fused_kernel(x_ref, m1_ref, b1_ref, s1_ref, m2_ref, b2_ref, s2_ref,
                          mt_ref, bt_ref, o_ref):
    def matmul(a, w):   # bf16 operands, f32 accumulate (MXU native)
        return jnp.dot(a.astype(jnp.bfloat16), w,
                       preferred_element_type=jnp.float32)

    def dense_relu(a, w, b):
        return jnp.maximum(matmul(a, w) + b, 0.0)

    def maxpool(a, s_ref):
        # 2x2 = 4 taps gathered by one 0/1-selection matmul, then pairwise max.
        fo = s_ref.shape[1] // 4
        taps = matmul(a, s_ref[...])
        return jnp.maximum(jnp.maximum(taps[:, :fo], taps[:, fo:2 * fo]),
                           jnp.maximum(taps[:, 2 * fo:3 * fo], taps[:, 3 * fo:]))

    x = x_ref[...]
    x = dense_relu(x, m1_ref[...], b1_ref[...])     # conv1 + relu
    x = maxpool(x, s1_ref)                          # pool1
    x = dense_relu(x, m2_ref[...], b2_ref[...])     # conv2 + relu
    x = maxpool(x, s2_ref)                          # pool2
    for l in range(5):                              # conv3, conv4, dc5, dc4, dc3 (+relu)
        x = dense_relu(x, mt_ref[l], bt_ref[l])
    # deconv2 epilogue: relu followed by the final hardtanh == clip to [0, 1]
    x = jnp.clip(matmul(x, mt_ref[5]) + bt_ref[5], 0.0, 1.0)
    o_ref[...] = x


@jax.jit
def convnet_forward(ops, x):
    N = x.shape[0]
    assert N <= NUM_ROWS
    xf = x.reshape(N, -1).astype(jnp.float32)       # NCHW row-major flatten
    x_p = jnp.zeros((NUM_ROWS, IN_FEATS), jnp.float32).at[:N].set(xf)

    operands = (x_p, ops["M1"], ops["b1"], ops["S1"],
                ops["M2"], ops["b2"], ops["S2"], ops["Mt"], ops["bt"])
    out = pl.pallas_call(
        _convnet_fused_kernel,
        out_shape=jax.ShapeDtypeStruct((NUM_ROWS, OUT_PAD), jnp.float32),
        grid=(1,),
        in_specs=[pl.BlockSpec(a.shape, lambda i, nd=a.ndim: (0,) * nd)
                  for a in operands],
        out_specs=pl.BlockSpec((NUM_ROWS, OUT_PAD), lambda i: (0, 0)),
        compiler_params=pltpu.CompilerParams(
            dimension_semantics=("arbitrary",)),
    )(*operands)

    C, H, W = OUT_CHW
    y = out[:N, :OUT_FEATS].reshape(N, C, H, W)
    return y, y


# ---------------------------------------------------------------------------
# Pure-XLA f32 reference (PyTorch layer semantics) for a sanity cross-check
# ---------------------------------------------------------------------------
def reference_forward(raw, x):
    def conv(x, wb, stride, pad):
        w, b = wb
        y = jax.lax.conv_general_dilated(
            x, w, (stride, stride), [(pad, pad), (pad, pad)],
            dimension_numbers=("NCHW", "OIHW", "NCHW"))
        return y + b.reshape(1, -1, 1, 1)

    def deconv(x, wb, stride, pad, out_pad):
        w, b = wb
        k = w.shape[2]
        lo = k - 1 - pad
        w_conv = jnp.flip(w, (2, 3)).transpose(1, 0, 2, 3)
        y = jax.lax.conv_general_dilated(
            x, w_conv, (1, 1), [(lo, lo + out_pad), (lo, lo + out_pad)],
            lhs_dilation=(stride, stride),
            dimension_numbers=("NCHW", "OIHW", "NCHW"))
        return y + b.reshape(1, -1, 1, 1)

    def pool(x, k, stride, pad):
        return jax.lax.reduce_window(
            x, -jnp.inf, jax.lax.max, (1, 1, k, k), (1, 1, stride, stride),
            [(0, 0), (0, 0), (pad, pad), (pad, pad)])

    relu = lambda t: jnp.maximum(t, 0.0)
    x = relu(conv(x, raw["conv1"], 3, 1))
    x = pool(x, 2, 2, 1)
    x = relu(conv(x, raw["conv2"], 2, 1))
    x = pool(x, 2, 2, 0)
    x = relu(conv(x, raw["conv3"], 2, 1))
    x = relu(conv(x, raw["conv4"], 1, 1))
    x = relu(deconv(x, raw["deconv5"], 1, 1, 0))
    x = relu(deconv(x, raw["deconv4"], 2, 1, 1))
    x = relu(deconv(x, raw["deconv3"], 3, 1, 0))
    x = relu(deconv(x, raw["deconv2"], 1, 1, 0))
    return jnp.clip(x, -1.0, 1.0)


if __name__ == "__main__":
    key = jax.random.PRNGKey(0)
    pkey, xkey = jax.random.split(key)
    raw = init_raw_params(pkey)
    ops = build_fused_operands(raw)          # one-time weight preprocessing
    x = jax.random.normal(xkey, (2, 1, 16, 16), jnp.float32)   # N=2, C=1, 16x16

    y1, y2 = convnet_forward(ops, x)
    jax.block_until_ready((y1, y2))

    ref = jax.block_until_ready(jax.jit(reference_forward)(raw, x))

    assert y1.shape == (2, 1, 4, 4) and y2.shape == (2, 1, 4, 4)
    assert bool(jnp.all(y1 >= -1.0)) and bool(jnp.all(y1 <= 1.0))
    np.testing.assert_allclose(np.asarray(y1), np.asarray(ref), rtol=0.1, atol=0.1)
    print("KERNEL_OK")
</pallas_src>

<mosaic_0001>
module attributes {stable_mosaic.version = 11 : i64} {
  func.func @_convnet_fused_kernel(%arg0: i32, %arg1: memref<8x256xf32, #tpu.memory_space<vmem>>, %arg2: memref<256x384xbf16, #tpu.memory_space<vmem>>, %arg3: memref<1x384xf32, #tpu.memory_space<vmem>>, %arg4: memref<384x512xbf16, #tpu.memory_space<vmem>>, %arg5: memref<128x128xbf16, #tpu.memory_space<vmem>>, %arg6: memref<1x128xf32, #tpu.memory_space<vmem>>, %arg7: memref<128x512xbf16, #tpu.memory_space<vmem>>, %arg8: memref<6x128x128xbf16, #tpu.memory_space<vmem>>, %arg9: memref<6x1x128xf32, #tpu.memory_space<vmem>>, %arg10: memref<8x128xf32, #tpu.memory_space<vmem>>) attributes {dimension_semantics = [#tpu.dimension_semantics<arbitrary>], iteration_bounds = array<i64: 1>, scalar_prefetch = 0 : i64, scratch_operands = 0 : i64, tpu.core_type = #tpu.core_type<tc>, window_params = [{pipeline_mode = #tpu.pipeline_mode<synchronous>, transform_indices = @transform_0, window_bounds = array<i64: 8, 256>}, {pipeline_mode = #tpu.pipeline_mode<synchronous>, transform_indices = @transform_1, window_bounds = array<i64: 256, 384>}, {pipeline_mode = #tpu.pipeline_mode<synchronous>, transform_indices = @transform_2, window_bounds = array<i64: 1, 384>}, {pipeline_mode = #tpu.pipeline_mode<synchronous>, transform_indices = @transform_3, window_bounds = array<i64: 384, 512>}, {pipeline_mode = #tpu.pipeline_mode<synchronous>, transform_indices = @transform_4, window_bounds = array<i64: 128, 128>}, {pipeline_mode = #tpu.pipeline_mode<synchronous>, transform_indices = @transform_5, window_bounds = array<i64: 1, 128>}, {pipeline_mode = #tpu.pipeline_mode<synchronous>, transform_indices = @transform_6, window_bounds = array<i64: 128, 512>}, {pipeline_mode = #tpu.pipeline_mode<synchronous>, transform_indices = @transform_7, window_bounds = array<i64: 6, 128, 128>}, {pipeline_mode = #tpu.pipeline_mode<synchronous>, transform_indices = @transform_8, window_bounds = array<i64: 6, 1, 128>}, {pipeline_mode = #tpu.pipeline_mode<synchronous>, transform_indices = @transform_9, window_bounds = array<i64: 8, 128>}]} {
    %c0 = arith.constant 0 : index
    %c0_0 = arith.constant 0 : index
    %0 = vector.load %arg1[%c0, %c0_0] : memref<8x256xf32, #tpu.memory_space<vmem>>, vector<8x256xf32>
    %c0_1 = arith.constant 0 : index
    %c0_2 = arith.constant 0 : index
    %1 = vector.load %arg2[%c0_1, %c0_2] : memref<256x384xbf16, #tpu.memory_space<vmem>>, vector<256x384xbf16>
    %c0_3 = arith.constant 0 : index
    %c0_4 = arith.constant 0 : index
    %2 = vector.load %arg3[%c0_3, %c0_4] : memref<1x384xf32, #tpu.memory_space<vmem>>, vector<1x384xf32>
    %3 = arith.truncf %0 : vector<8x256xf32> to vector<8x256xbf16>
    %cst = arith.constant dense<0.000000e+00> : vector<8x384xf32>
    %4 = tpu.matmul %3, %1, %cst {dimension_numbers = #tpu.dot_dimension_numbers<[1], [0], [0], [1], [0, 0, 1, 1], [], []>} : vector<8x256xbf16>, vector<256x384xbf16>, vector<8x384xf32> -> vector<8x384xf32>
    %5 = vector.broadcast %2 : vector<1x384xf32> to vector<8x384xf32>
    %6 = arith.addf %4, %5 : vector<8x384xf32>
    %cst_5 = arith.constant 0.000000e+00 : f32
    %7 = vector.broadcast %cst_5 : f32 to vector<8x384xf32>
    %8 = arith.maximumf %6, %7 : vector<8x384xf32>
    %c0_6 = arith.constant 0 : index
    %c0_7 = arith.constant 0 : index
    %9 = vector.load %arg4[%c0_6, %c0_7] : memref<384x512xbf16, #tpu.memory_space<vmem>>, vector<384x512xbf16>
    %10 = arith.truncf %8 : vector<8x384xf32> to vector<8x384xbf16>
    %cst_8 = arith.constant dense<0.000000e+00> : vector<8x512xf32>
    %11 = tpu.matmul %10, %9, %cst_8 {dimension_numbers = #tpu.dot_dimension_numbers<[1], [0], [0], [1], [0, 0, 1, 1], [], []>} : vector<8x384xbf16>, vector<384x512xbf16>, vector<8x512xf32> -> vector<8x512xf32>
    %12 = vector.extract_strided_slice %11 {offsets = [0, 0], sizes = [8, 128], strides = [1, 1]} : vector<8x512xf32> to vector<8x128xf32>
    %13 = vector.extract_strided_slice %11 {offsets = [0, 128], sizes = [8, 128], strides = [1, 1]} : vector<8x512xf32> to vector<8x128xf32>
    %14 = arith.maximumf %12, %13 : vector<8x128xf32>
    %15 = vector.extract_strided_slice %11 {offsets = [0, 256], sizes = [8, 128], strides = [1, 1]} : vector<8x512xf32> to vector<8x128xf32>
    %16 = vector.extract_strided_slice %11 {offsets = [0, 384], sizes = [8, 128], strides = [1, 1]} : vector<8x512xf32> to vector<8x128xf32>
    %17 = arith.maximumf %15, %16 : vector<8x128xf32>
    %18 = arith.maximumf %14, %17 : vector<8x128xf32>
    %c0_9 = arith.constant 0 : index
    %c0_10 = arith.constant 0 : index
    %19 = vector.load %arg5[%c0_9, %c0_10] : memref<128x128xbf16, #tpu.memory_space<vmem>>, vector<128x128xbf16>
    %c0_11 = arith.constant 0 : index
    %c0_12 = arith.constant 0 : index
    %20 = vector.load %arg6[%c0_11, %c0_12] : memref<1x128xf32, #tpu.memory_space<vmem>>, vector<1x128xf32>
    %21 = arith.truncf %18 : vector<8x128xf32> to vector<8x128xbf16>
    %cst_13 = arith.constant dense<0.000000e+00> : vector<8x128xf32>
    %22 = tpu.matmul %21, %19, %cst_13 {dimension_numbers = #tpu.dot_dimension_numbers<[1], [0], [0], [1], [0, 0, 1, 1], [], []>} : vector<8x128xbf16>, vector<128x128xbf16>, vector<8x128xf32> -> vector<8x128xf32>
    %23 = vector.broadcast %20 : vector<1x128xf32> to vector<8x128xf32>
    %24 = arith.addf %22, %23 : vector<8x128xf32>
    %cst_14 = arith.constant 0.000000e+00 : f32
    %25 = vector.broadcast %cst_14 : f32 to vector<8x128xf32>
    %26 = arith.maximumf %24, %25 : vector<8x128xf32>
    %c0_15 = arith.constant 0 : index
    %c0_16 = arith.constant 0 : index
    %27 = vector.load %arg7[%c0_15, %c0_16] : memref<128x512xbf16, #tpu.memory_space<vmem>>, vector<128x512xbf16>
    %28 = arith.truncf %26 : vector<8x128xf32> to vector<8x128xbf16>
    %cst_17 = arith.constant dense<0.000000e+00> : vector<8x512xf32>
    %29 = tpu.matmul %28, %27, %cst_17 {dimension_numbers = #tpu.dot_dimension_numbers<[1], [0], [0], [1], [0, 0, 1, 1], [], []>} : vector<8x128xbf16>, vector<128x512xbf16>, vector<8x512xf32> -> vector<8x512xf32>
    %30 = vector.extract_strided_slice %29 {offsets = [0, 0], sizes = [8, 128], strides = [1, 1]} : vector<8x512xf32> to vector<8x128xf32>
    %31 = vector.extract_strided_slice %29 {offsets = [0, 128], sizes = [8, 128], strides = [1, 1]} : vector<8x512xf32> to vector<8x128xf32>
    %32 = arith.maximumf %30, %31 : vector<8x128xf32>
    %33 = vector.extract_strided_slice %29 {offsets = [0, 256], sizes = [8, 128], strides = [1, 1]} : vector<8x512xf32> to vector<8x128xf32>
    %34 = vector.extract_strided_slice %29 {offsets = [0, 384], sizes = [8, 128], strides = [1, 1]} : vector<8x512xf32> to vector<8x128xf32>
    %35 = arith.maximumf %33, %34 : vector<8x128xf32>
    %36 = arith.maximumf %32, %35 : vector<8x128xf32>
    %c0_18 = arith.constant 0 : index
    %c0_19 = arith.constant 0 : index
    %c0_20 = arith.constant 0 : index
    %37 = vector.load %arg8[%c0_18, %c0_19, %c0_20] : memref<6x128x128xbf16, #tpu.memory_space<vmem>>, vector<1x128x128xbf16>
    %38 = vector.shape_cast %37 : vector<1x128x128xbf16> to vector<128x128xbf16>
    %c0_21 = arith.constant 0 : index
    %c0_22 = arith.constant 0 : index
    %c0_23 = arith.constant 0 : index
    %39 = vector.load %arg9[%c0_21, %c0_22, %c0_23] : memref<6x1x128xf32, #tpu.memory_space<vmem>>, vector<1x1x128xf32>
    %40 = vector.shape_cast %39 : vector<1x1x128xf32> to vector<1x128xf32>
    %41 = arith.truncf %36 : vector<8x128xf32> to vector<8x128xbf16>
    %cst_24 = arith.constant dense<0.000000e+00> : vector<8x128xf32>
    %42 = tpu.matmul %41, %38, %cst_24 {dimension_numbers = #tpu.dot_dimension_numbers<[1], [0], [0], [1], [0, 0, 1, 1], [], []>} : vector<8x128xbf16>, vector<128x128xbf16>, vector<8x128xf32> -> vector<8x128xf32>
    %43 = vector.broadcast %40 : vector<1x128xf32> to vector<8x128xf32>
    %44 = arith.addf %42, %43 : vector<8x128xf32>
    %cst_25 = arith.constant 0.000000e+00 : f32
    %45 = vector.broadcast %cst_25 : f32 to vector<8x128xf32>
    %46 = arith.maximumf %44, %45 : vector<8x128xf32>
    %c1 = arith.constant 1 : index
    %c0_26 = arith.constant 0 : index
    %c0_27 = arith.constant 0 : index
    %47 = vector.load %arg8[%c1, %c0_26, %c0_27] : memref<6x128x128xbf16, #tpu.memory_space<vmem>>, vector<1x128x128xbf16>
    %48 = vector.shape_cast %47 : vector<1x128x128xbf16> to vector<128x128xbf16>
    %c1_28 = arith.constant 1 : index
    %c0_29 = arith.constant 0 : index
    %c0_30 = arith.constant 0 : index
    %49 = vector.load %arg9[%c1_28, %c0_29, %c0_30] : memref<6x1x128xf32, #tpu.memory_space<vmem>>, vector<1x1x128xf32>
    %50 = vector.shape_cast %49 : vector<1x1x128xf32> to vector<1x128xf32>
    %51 = arith.truncf %46 : vector<8x128xf32> to vector<8x128xbf16>
    %cst_31 = arith.constant dense<0.000000e+00> : vector<8x128xf32>
    %52 = tpu.matmul %51, %48, %cst_31 {dimension_numbers = #tpu.dot_dimension_numbers<[1], [0], [0], [1], [0, 0, 1, 1], [], []>} : vector<8x128xbf16>, vector<128x128xbf16>, vector<8x128xf32> -> vector<8x128xf32>
    %53 = vector.broadcast %50 : vector<1x128xf32> to vector<8x128xf32>
    %54 = arith.addf %52, %53 : vector<8x128xf32>
    %cst_32 = arith.constant 0.000000e+00 : f32
    %55 = vector.broadcast %cst_32 : f32 to vector<8x128xf32>
    %56 = arith.maximumf %54, %55 : vector<8x128xf32>
    %c2 = arith.constant 2 : index
    %c0_33 = arith.constant 0 : index
    %c0_34 = arith.constant 0 : index
    %57 = vector.load %arg8[%c2, %c0_33, %c0_34] : memref<6x128x128xbf16, #tpu.memory_space<vmem>>, vector<1x128x128xbf16>
    %58 = vector.shape_cast %57 : vector<1x128x128xbf16> to vector<128x128xbf16>
    %c2_35 = arith.constant 2 : index
    %c0_36 = arith.constant 0 : index
    %c0_37 = arith.constant 0 : index
    %59 = vector.load %arg9[%c2_35, %c0_36, %c0_37] : memref<6x1x128xf32, #tpu.memory_space<vmem>>, vector<1x1x128xf32>
    %60 = vector.shape_cast %59 : vector<1x1x128xf32> to vector<1x128xf32>
    %61 = arith.truncf %56 : vector<8x128xf32> to vector<8x128xbf16>
    %cst_38 = arith.constant dense<0.000000e+00> : vector<8x128xf32>
    %62 = tpu.matmul %61, %58, %cst_38 {dimension_numbers = #tpu.dot_dimension_numbers<[1], [0], [0], [1], [0, 0, 1, 1], [], []>} : vector<8x128xbf16>, vector<128x128xbf16>, vector<8x128xf32> -> vector<8x128xf32>
    %63 = vector.broadcast %60 : vector<1x128xf32> to vector<8x128xf32>
    %64 = arith.addf %62, %63 : vector<8x128xf32>
    %cst_39 = arith.constant 0.000000e+00 : f32
    %65 = vector.broadcast %cst_39 : f32 to vector<8x128xf32>
    %66 = arith.maximumf %64, %65 : vector<8x128xf32>
    %c3 = arith.constant 3 : index
    %c0_40 = arith.constant 0 : index
    %c0_41 = arith.constant 0 : index
    %67 = vector.load %arg8[%c3, %c0_40, %c0_41] : memref<6x128x128xbf16, #tpu.memory_space<vmem>>, vector<1x128x128xbf16>
    %68 = vector.shape_cast %67 : vector<1x128x128xbf16> to vector<128x128xbf16>
    %c3_42 = arith.constant 3 : index
    %c0_43 = arith.constant 0 : index
    %c0_44 = arith.constant 0 : index
    %69 = vector.load %arg9[%c3_42, %c0_43, %c0_44] : memref<6x1x128xf32, #tpu.memory_space<vmem>>, vector<1x1x128xf32>
    %70 = vector.shape_cast %69 : vector<1x1x128xf32> to vector<1x128xf32>
    %71 = arith.truncf %66 : vector<8x128xf32> to vector<8x128xbf16>
    %cst_45 = arith.constant dense<0.000000e+00> : vector<8x128xf32>
    %72 = tpu.matmul %71, %68, %cst_45 {dimension_numbers = #tpu.dot_dimension_numbers<[1], [0], [0], [1], [0, 0, 1, 1], [], []>} : vector<8x128xbf16>, vector<128x128xbf16>, vector<8x128xf32> -> vector<8x128xf32>
    %73 = vector.broadcast %70 : vector<1x128xf32> to vector<8x128xf32>
    %74 = arith.addf %72, %73 : vector<8x128xf32>
    %cst_46 = arith.constant 0.000000e+00 : f32
    %75 = vector.broadcast %cst_46 : f32 to vector<8x128xf32>
    %76 = arith.maximumf %74, %75 : vector<8x128xf32>
    %c4 = arith.constant 4 : index
    %c0_47 = arith.constant 0 : index
    %c0_48 = arith.constant 0 : index
    %77 = vector.load %arg8[%c4, %c0_47, %c0_48] : memref<6x128x128xbf16, #tpu.memory_space<vmem>>, vector<1x128x128xbf16>
    %78 = vector.shape_cast %77 : vector<1x128x128xbf16> to vector<128x128xbf16>
    %c4_49 = arith.constant 4 : index
    %c0_50 = arith.constant 0 : index
    %c0_51 = arith.constant 0 : index
    %79 = vector.load %arg9[%c4_49, %c0_50, %c0_51] : memref<6x1x128xf32, #tpu.memory_space<vmem>>, vector<1x1x128xf32>
    %80 = vector.shape_cast %79 : vector<1x1x128xf32> to vector<1x128xf32>
    %81 = arith.truncf %76 : vector<8x128xf32> to vector<8x128xbf16>
    %cst_52 = arith.constant dense<0.000000e+00> : vector<8x128xf32>
    %82 = tpu.matmul %81, %78, %cst_52 {dimension_numbers = #tpu.dot_dimension_numbers<[1], [0], [0], [1], [0, 0, 1, 1], [], []>} : vector<8x128xbf16>, vector<128x128xbf16>, vector<8x128xf32> -> vector<8x128xf32>
    %83 = vector.broadcast %80 : vector<1x128xf32> to vector<8x128xf32>
    %84 = arith.addf %82, %83 : vector<8x128xf32>
    %cst_53 = arith.constant 0.000000e+00 : f32
    %85 = vector.broadcast %cst_53 : f32 to vector<8x128xf32>
    %86 = arith.maximumf %84, %85 : vector<8x128xf32>
    %c5 = arith.constant 5 : index
    %c0_54 = arith.constant 0 : index
    %c0_55 = arith.constant 0 : index
    %87 = vector.load %arg8[%c5, %c0_54, %c0_55] : memref<6x128x128xbf16, #tpu.memory_space<vmem>>, vector<1x128x128xbf16>
    %88 = vector.shape_cast %87 : vector<1x128x128xbf16> to vector<128x128xbf16>
    %89 = arith.truncf %86 : vector<8x128xf32> to vector<8x128xbf16>
    %cst_56 = arith.constant dense<0.000000e+00> : vector<8x128xf32>
    %90 = tpu.matmul %89, %88, %cst_56 {dimension_numbers = #tpu.dot_dimension_numbers<[1], [0], [0], [1], [0, 0, 1, 1], [], []>} : vector<8x128xbf16>, vector<128x128xbf16>, vector<8x128xf32> -> vector<8x128xf32>
    %c5_57 = arith.constant 5 : index
    %c0_58 = arith.constant 0 : index
    %c0_59 = arith.constant 0 : index
    %91 = vector.load %arg9[%c5_57, %c0_58, %c0_59] : memref<6x1x128xf32, #tpu.memory_space<vmem>>, vector<1x1x128xf32>
    %92 = vector.shape_cast %91 : vector<1x1x128xf32> to vector<1x128xf32>
    %93 = vector.broadcast %92 : vector<1x128xf32> to vector<8x128xf32>
    %94 = arith.addf %90, %93 : vector<8x128xf32>
    %cst_60 = arith.constant 0.000000e+00 : f32
    %cst_61 = arith.constant 1.000000e+00 : f32
    %95 = vector.broadcast %cst_60 : f32 to vector<8x128xf32>
    %96 = arith.maximumf %95, %94 : vector<8x128xf32>
    %97 = vector.broadcast %cst_61 : f32 to vector<8x128xf32>
    %98 = arith.minimumf %97, %96 : vector<8x128xf32>
    %c0_62 = arith.constant 0 : index
    %c0_63 = arith.constant 0 : index
    %99 = vector.load %arg10[%c0_62, %c0_63] : memref<8x128xf32, #tpu.memory_space<vmem>>, vector<8x128xf32>
    tpu.vector_store %arg10[%c0_62, %c0_63], %98 {strides = array<i32>} : memref<8x128xf32, #tpu.memory_space<vmem>>, vector<8x128xf32>,
    return
  }
  func.func @transform_0(%arg0: i32) -> (i32, i32) {
    %c0_i32 = arith.constant 0 : i32
    %c0_i32_0 = arith.constant 0 : i32
    %c0_i32_1 = arith.constant 0 : i32
    return %c0_i32, %c0_i32_0 : i32, i32
  }
  func.func @transform_1(%arg0: i32) -> (i32, i32) {
    %c0_i32 = arith.constant 0 : i32
    %c0_i32_0 = arith.constant 0 : i32
    %c0_i32_1 = arith.constant 0 : i32
    return %c0_i32, %c0_i32_0 : i32, i32
  }
  func.func @transform_2(%arg0: i32) -> (i32, i32) {
    %c0_i32 = arith.constant 0 : i32
    %c0_i32_0 = arith.constant 0 : i32
    %c0_i32_1 = arith.constant 0 : i32
    return %c0_i32, %c0_i32_0 : i32, i32
  }
  func.func @transform_3(%arg0: i32) -> (i32, i32) {
    %c0_i32 = arith.constant 0 : i32
    %c0_i32_0 = arith.constant 0 : i32
    %c0_i32_1 = arith.constant 0 : i32
    return %c0_i32, %c0_i32_0 : i32, i32
  }
  func.func @transform_4(%arg0: i32) -> (i32, i32) {
    %c0_i32 = arith.constant 0 : i32
    %c0_i32_0 = arith.constant 0 : i32
    %c0_i32_1 = arith.constant 0 : i32
    return %c0_i32, %c0_i32_0 : i32, i32
  }
  func.func @transform_5(%arg0: i32) -> (i32, i32) {
    %c0_i32 = arith.constant 0 : i32
    %c0_i32_0 = arith.constant 0 : i32
    %c0_i32_1 = arith.constant 0 : i32
    return %c0_i32, %c0_i32_0 : i32, i32
  }
  func.func @transform_6(%arg0: i32) -> (i32, i32) {
    %c0_i32 = arith.constant 0 : i32
    %c0_i32_0 = arith.constant 0 : i32
    %c0_i32_1 = arith.constant 0 : i32
    return %c0_i32, %c0_i32_0 : i32, i32
  }
  func.func @transform_7(%arg0: i32) -> (i32, i32, i32) {
    %c0_i32 = arith.constant 0 : i32
    %c0_i32_0 = arith.constant 0 : i32
    %c0_i32_1 = arith.constant 0 : i32
    %c0_i32_2 = arith.constant 0 : i32
    return %c0_i32, %c0_i32_0, %c0_i32_1 : i32, i32, i32
  }
  func.func @transform_8(%arg0: i32) -> (i32, i32, i32) {
    %c0_i32 = arith.constant 0 : i32
    %c0_i32_0 = arith.constant 0 : i32
    %c0_i32_1 = arith.constant 0 : i32
    %c0_i32_2 = arith.constant 0 : i32
    return %c0_i32, %c0_i32_0, %c0_i32_1 : i32, i32, i32
  }
  func.func @transform_9(%arg0: i32) -> (i32, i32) {
    %c0_i32 = arith.constant 0 : i32
    %c0_i32_0 = arith.constant 0 : i32
    %c0_i32_1 = arith.constant 0 : i32
    return %c0_i32, %c0_i32_0 : i32, i32
  }
}

</mosaic_0001>

<bundles_post_ra>
// kernel: convnet_forward.1
= control target key start
LH: loop header
LB: loop body
LE: loop exit
PB: predicated region body
PF: predicated region fallthrough
CT: control target
= control target key end

     0   :  { %14 = vsyncpa [#allocation3], 0  ;;  %s3518_s0 = inlined_call_operand.vmem [shape: f32[8,256], index: 0, kind: input, shape index: {}]   ;;  %s3519_s1 = inlined_call_operand.hbm [shape: bf16[256,384], index: 1, kind: input, shape index: {}]   ;;  %s3520_s2 = inlined_call_operand.vmem [shape: f32[1,384], index: 2, kind: input, shape index: {}]   ;;  %s3521_s3 = inlined_call_operand.hbm [shape: bf16[384,512], index: 3, kind: input, shape index: {}]   ;;  %s3522_s4 = inlined_call_operand.hbm [shape: bf16[128,128], index: 4, kind: input, shape index: {}]   ;;  %s3523_s5 = inlined_call_operand.vmem [shape: f32[1,128], index: 5, kind: input, shape index: {}]   ;;  %s3524_s6 = inlined_call_operand.hbm [shape: bf16[128,512], index: 6, kind: input, shape index: {}]   ;;  %s3525_s7 = inlined_call_operand.hbm [shape: bf16[6,128,128], index: 7, kind: input, shape index: {}]   ;;  %s3526_s8 = inlined_call_operand.vmem [shape: f32[6,1,128], index: 8, kind: input, shape index: {}]   ;;  %s3527_s9 = inlined_call_operand.vmem [shape: f32[8,128], index: 9, kind: output, shape index: {}]  }
   0x1   :  { %15 = vsyncpa [#allocation5], 0 }
   0x2   :  { %16 = vsyncpa [#allocation8], 0  ;;  %s3279_s30 = smov [#allocation4]   ;;  %s3163_s13 = scalar_lea.hbm %s3521_s3, 12288 }
   0x3   :  { %s38_s10 = sshll.u32 %s3279_s30, 4  ;;  %p3164_p0 = scmp.ne.s32.totalorder %s3521_s3, %s3163_s13  ;;  %s39_s10 = int_to_ptr.vmem [resolvable:$true] %s38_s10 }
   0x4   :  { %p3167_p1 = scmp.lt.u32.totalorder %s3163_s13, %s3521_s3 }
   0x6   :  { %p3169_p2 = pnand %p3167_p1, %p3164_p0 }
   0x8   :  { %3172 = shalt.err (!%p3169_p2)
}
   0x9   :  { %s3173_s18 = scalar_lea.vmem %s39_s10, 12288  ;;  %p3178_p4 = scmp.lt.s32.totalorder %s39_s10, %s39_s10 }
   0xa   :  { %p3174_p3 = scmp.ne.s32.totalorder %s39_s10, %s3173_s18  ;;  %p3179_p5 = scmp.lt.s32.totalorder %s3173_s18, %s3173_s18 }
   0xc   :  { %p3180_p6 = por %p3179_p5, %p3178_p4 }
   0xe   :  { %p3181_p7 = pnand %p3180_p6, %p3174_p3 }
  0x10   :  { %3184 = shalt.err (!%p3181_p7)
}
  0x11   :  { %s3280_s19 = smov 256   ;;  %s3281_s20 = smov 16  }
  0x12   :  { %44 = dma.hbm_to_vmem [thread:$0]  %s3521_s3, 12288, %s39_s10, [#allocation5], %s3280_s19, %s3280_s19, %s3281_s20  }
  0x13   :  { %s3282_s23 = smov [#allocation7]   ;;  %s3283_s25 = smov [#allocation2]  }
  0x14   :  { %s64_s24 = sshll.u32 %s3282_s23, 4  ;;  %s24_s26 = sshll.u32 %s3283_s25, 4  ;;  %s65_s24 = int_to_ptr.vmem [resolvable:$true] %s64_s24  ;;  %s25_s26 = int_to_ptr.vmem [resolvable:$true] %s24_s26 }
  0x15   :  { %s3185_s29 = scalar_lea.hbm %s3524_s6, 4096 }
  0x16   :  { %p3186_p8 = scmp.ne.s32.totalorder %s3524_s6, %s3185_s29  ;;  %p3189_p9 = scmp.lt.u32.totalorder %s3185_s29, %s3524_s6 }
  0x18   :  { %p3191_p10 = pnand %p3189_p9, %p3186_p8 }
  0x1a   :  { %3194 = shalt.err (!%p3191_p10)
}
  0x1b   :  { %s3195_s3 = scalar_lea.vmem %s65_s24, 4096  ;;  %p3200_p12 = scmp.lt.s32.totalorder %s65_s24, %s65_s24 }
  0x1c   :  { %p3196_p11 = scmp.ne.s32.totalorder %s65_s24, %s3195_s3  ;;  %p3201_p13 = scmp.lt.s32.totalorder %s3195_s3, %s3195_s3 }
  0x1e   :  { %p3202_p0 = por %p3201_p13, %p3200_p12 }
  0x20   :  { %p3203_p1 = pnand %p3202_p0, %p3196_p11 }
  0x22   :  { %3206 = shalt.err (!%p3203_p1)
}
  0x23   :  { %70 = dma.hbm_to_vmem [thread:$0]  %s3524_s6, 4096, %s65_s24, [#allocation8], %s3280_s19, %s3280_s19, %s3281_s20  }
  0x24   :  { %s3207_s17 = scalar_lea.hbm %s3519_s1, 6144 }
  0x25   :  { %p3208_p2 = scmp.ne.s32.totalorder %s3519_s1, %s3207_s17  ;;  %p3211_p3 = scmp.lt.u32.totalorder %s3207_s17, %s3519_s1 }
  0x27   :  { %p3213_p4 = pnand %p3211_p3, %p3208_p2 }
  0x29   :  { %3216 = shalt.err (!%p3213_p4)
}
  0x2a   :  { %s3217_s25 = scalar_lea.vmem %s25_s26, 6144  ;;  %p3222_p6 = scmp.lt.s32.totalorder %s25_s26, %s25_s26 }
  0x2b   :  { %p3218_p5 = scmp.ne.s32.totalorder %s25_s26, %s3217_s25  ;;  %p3223_p7 = scmp.lt.s32.totalorder %s3217_s25, %s3217_s25 }
  0x2d   :  { %p3224_p8 = por %p3223_p7, %p3222_p6 }
  0x2f   :  { %p3225_p9 = pnand %p3224_p8, %p3218_p5 }
  0x31   :  { %3228 = shalt.err (!%p3225_p9)
}
  0x32   :  { %s3284_s6 = smov 192   ;;  %s3285_s19 = smov 12  }
  0x33   :  { %30 = dma.hbm_to_vmem [thread:$0]  %s3519_s1, 6144, %s25_s26, [#allocation3], %s3284_s6, %s3284_s6, %s3285_s19  }
  0x34   :  { %s3286_s27 = smov [#allocation6]   ;;  %s3229_s11 = scalar_lea.hbm %s3522_s4, 1024 }
  0x35   :  { %s50_s28 = sshll.u32 %s3286_s27, 4  ;;  %p3230_p10 = scmp.ne.s32.totalorder %s3522_s4, %s3229_s11  ;;  %s51_s28 = int_to_ptr.vmem [resolvable:$true] %s50_s28 }
  0x36   :  { %p3233_p11 = scmp.lt.u32.totalorder %s3229_s11, %s3522_s4 }
  0x38   :  { %p3235_p12 = pnand %p3233_p11, %p3230_p10 }
  0x3a   :  { %3238 = shalt.err (!%p3235_p12)
}
  0x3b   :  { %s3239_s14 = scalar_lea.vmem %s51_s28, 1024  ;;  %p3244_p0 = scmp.lt.s32.totalorder %s51_s28, %s51_s28 }
  0x3c   :  { %p3240_p13 = scmp.ne.s32.totalorder %s51_s28, %s3239_s14  ;;  %p3245_p1 = scmp.lt.s32.totalorder %s3239_s14, %s3239_s14 }
  0x3e   :  { %p3246_p2 = por %p3245_p1, %p3244_p0 }
  0x40   :  { %p3247_p3 = pnand %p3246_p2, %p3240_p13 }
  0x42   :  { %3250 = shalt.err (!%p3247_p3)
}
  0x43   :  { %s3287_s1 = smov 64   ;;  %s3288_s26 = smov 4  }
  0x44   :  { %56 = dma.hbm_to_vmem [thread:$0]  %s3522_s4, 1024, %s51_s28, [#allocation5], %s3287_s1, %s3287_s1, %s3288_s26  }
  0x45   :  { %s3289_s17 = smov [#allocation9]   ;;  %s3251_s23 = scalar_lea.hbm %s3525_s7, 6144 }
  0x46   :  { %s76_s18 = sshll.u32 %s3289_s17, 4  ;;  %p3252_p4 = scmp.ne.s32.totalorder %s3525_s7, %s3251_s23  ;;  %s77_s18 = int_to_ptr.vmem [resolvable:$true] %s76_s18 }
  0x47   :  { %p3255_p5 = scmp.lt.u32.totalorder %s3251_s23, %s3525_s7 }
  0x49   :  { %p3257_p6 = pnand %p3255_p5, %p3252_p4 }
  0x4b   :  { %3260 = shalt.err (!%p3257_p6)
}
  0x4c   :  { %s3261_s24 = scalar_lea.vmem %s77_s18, 6144  ;;  %p3266_p8 = scmp.lt.s32.totalorder %s77_s18, %s77_s18 }
  0x4d   :  { %p3262_p7 = scmp.ne.s32.totalorder %s77_s18, %s3261_s24  ;;  %p3267_p9 = scmp.lt.s32.totalorder %s3261_s24, %s3261_s24 }
  0x4f   :  { %p3268_p10 = por %p3267_p9, %p3266_p8 }
  0x51   :  { %p3269_p11 = pnand %p3268_p10, %p3262_p7 }
  0x53   :  { %3272 = shalt.err (!%p3269_p11)
}
  0x54   :  { %82 = dma.hbm_to_vmem [thread:$0]  %s3525_s7, 6144, %s77_s18, [#allocation8], %s3287_s1, %s3287_s1, %s3288_s26  }
  0x55   :  { %3273 = dma.done.wait [#allocation3], 6144  }
  0x56   :  { %3274 = vsyncadd [#allocation3], 4294961152 }
  0x57   :  { %3275 = dma.done.wait [#allocation5], 13312  }
  0x58   :  { %3276 = vsyncadd [#allocation5], 4294953984 }
  0x59   :  { %3277 = dma.done.wait [#allocation8], 10240  }
  0x5a   :  { %3278 = vsyncadd [#allocation8], 4294957056  ;;  %v2851_v0 = vld [vmem:[#allocation2 + $0x4] ss:$12 sps:$4 sm:$0xff]   ;;  %v2853_v1 = vld [vmem:[#allocation2] ss:$12 sps:$4 sm:$0xff]  }
  0x5b   :  { %442 = vmatprep.subr.bf16.mxu0 %v2851_v0  ;;  %v2854_v2 = vld [vmem:[#allocation2 + $0x1c] ss:$12 sps:$4 sm:$0xff]   ;;  %v2856_v3 = vld [vmem:[#allocation2 + $0x18] ss:$12 sps:$4 sm:$0xff]   ;;  %v2857_v4 = vld [vmem:[#allocation2 + $0x34] ss:$12 sps:$4 sm:$0xff]  }
  0x5c   :  { %443 = vmatpush1.bf16.msra.mxu0 %v2853_v1  ;;  %v2859_v5 = vld [vmem:[#allocation2 + $0x30] ss:$12 sps:$4 sm:$0xff]   ;;  %v2860_v6 = vld [vmem:[#allocation2 + $0x4c] ss:$12 sps:$4 sm:$0xff]   ;;  %v2862_v7 = vld [vmem:[#allocation2 + $0x48] ss:$12 sps:$4 sm:$0xff]  }
  0x5d   :  { %444 = vmatprep.subr.bf16.mxu0 %v2854_v2  ;;  %v2863_v8 = vld [vmem:[#allocation2 + $0x64] ss:$12 sps:$4 sm:$0xff]   ;;  %v2865_v9 = vld [vmem:[#allocation2 + $0x60] ss:$12 sps:$4 sm:$0xff]   ;;  %v2866_v10 = vld [vmem:[#allocation2 + $0x7c] ss:$12 sps:$4 sm:$0xff]  }
  0x5e   :  { %v2868_v11 = vld [vmem:[#allocation2 + $0x78] ss:$12 sps:$4 sm:$0xff]   ;;  %v2869_v12 = vld [vmem:[#allocation2 + $0x94] ss:$12 sps:$4 sm:$0xff]   ;;  %v2871_v15 = vld [vmem:[#allocation2 + $0x90] ss:$12 sps:$4 sm:$0xff]  }
  0x5f   :  { %v2896_v13 = vld [vmem:[#allocation2 + $0xc8] ss:$12 sps:$4 sm:$0xff]   ;;  %v2872_v17 = vld [vmem:[#allocation2 + $0xac] ss:$12 sps:$4 sm:$0xff]   ;;  %v2875_v23 = vld [vmem:[#allocation2 + $0xc4] ss:$12 sps:$4 sm:$0xff]  }
  0x60   :  { %445 = vmatpush1.bf16.msra.mxu0 %v2856_v3  ;;  %2604 = vmatprep.subr.bf16.mxu1 %v2896_v13  ;;  %v2899_v14 = vld [vmem:[#allocation2 + $0x8] ss:$12 sps:$4 sm:$0xff]   ;;  %v2901_v19 = vld [vmem:[#allocation2 + $0xe0] ss:$12 sps:$4 sm:$0xff]   ;;  %v2903_v22 = vld [vmem:[#allocation2 + $0xf8] ss:$12 sps:$4 sm:$0xff]  }
  0x61   :  { %446 = vmatprep.subr.bf16.mxu0 %v2857_v4  ;;  %v102_v16 = vld [vmem:[%s3518_s0 + $0x8] sm:$0xff]  ;;  %2605 = vmatpush3.bf16.msra.mxu1 %v2899_v14  ;;  %v2904_v24 = vld [vmem:[#allocation2 + $0x38] ss:$12 sps:$4 sm:$0xff]   ;;  %v2905_v25 = vld [vmem:[#allocation2 + $0x110] ss:$12 sps:$4 sm:$0xff]   ;;  %vm3292_vm0 = vmmov 0  }
  0x62   :  { %v169_v18 = vpack.c.bf16 %v102_v16, %v102_v16  ;;  %v2874_v20 = vld [vmem:[#allocation2 + $0xa8] ss:$12 sps:$4 sm:$0xff]   ;;  %v2902_v21 = vld [vmem:[#allocation2 + $0x20] ss:$12 sps:$4 sm:$0xff]   ;;  %2606 = vmatprep.subr.bf16.mxu1 %v2901_v19  ;;  %v2906_v28 = vld [vmem:[#allocation2 + $0x50] ss:$12 sps:$4 sm:$0xff]  }
  0x63   :  { %v2877_v26 = vld [vmem:[#allocation2 + $0xc0] ss:$12 sps:$4 sm:$0xff]   ;;  %v2878_v27 = vld [vmem:[#allocation2 + $0xdc] ss:$12 sps:$4 sm:$0xff]   ;;  %v2880_v30 = vld [vmem:[#allocation2 + $0xd8] ss:$12 sps:$4 sm:$0xff]  }
  0x64   :  { %447 = vmatpush1.bf16.msra.mxu0 %v2859_v5  ;;  %474 = vmatprep.mubr.bf16.mxu0 %v169_v18  ;;  %v2907_v29 = vld [vmem:[#allocation2 + $0x128] ss:$12 sps:$4 sm:$0xff]   ;;  %v2909_v33 = vld [vmem:[#allocation2 + $0x140] ss:$12 sps:$4 sm:$0xff]   ;;  %v2883_v34 = vld [vmem:[#allocation2 + $0xf0] ss:$12 sps:$4 sm:$0xff]  }
  0x65   :  { %448 = vmatprep.subr.bf16.mxu0 %v2860_v6  ;;  %515 = vmatprep.mubr.bf16.mxu1 %v169_v18  ;;  %v2881_v31 = vld [vmem:[#allocation2 + $0xf4] ss:$12 sps:$4 sm:$0xff]   ;;  %v2884_v35 = vld [vmem:[#allocation2 + $0x10c] ss:$12 sps:$4 sm:$0xff]   ;;  %v2887_v39 = vld [vmem:[#allocation2 + $0x124] ss:$12 sps:$4 sm:$0xff]  }
  0x66   :  { %2607 = vmatpush3.bf16.msra.mxu1 %v2902_v21  ;;  %v2908_v32 = vld [vmem:[#allocation2 + $0x68] ss:$12 sps:$4 sm:$0xff]   ;;  %v2910_v36 = vld [vmem:[#allocation2 + $0x80] ss:$12 sps:$4 sm:$0xff]   ;;  %v2911_v37 = vld [vmem:[#allocation2 + $0x158] ss:$12 sps:$4 sm:$0xff]  }
  0x67   :  { %2608 = vmatprep.subr.bf16.mxu1 %v2903_v22  ;;  %v2886_v38 = vld [vmem:[#allocation2 + $0x108] ss:$12 sps:$4 sm:$0xff]   ;;  %v2912_v40 = vld [vmem:[#allocation2 + $0x98] ss:$12 sps:$4 sm:$0xff]   ;;  %v2913_v41 = vld [vmem:[#allocation2 + $0x170] ss:$12 sps:$4 sm:$0xff]  }
  0x68   :  { %449 = vmatpush1.bf16.msra.mxu0 %v2862_v7  ;;  %v2889_v42 = vld [vmem:[#allocation2 + $0x120] ss:$12 sps:$4 sm:$0xff]   ;;  %v2890_v43 = vld [vmem:[#allocation2 + $0x13c] ss:$12 sps:$4 sm:$0xff]   ;;  %v2917_v45 = vld [vmem:[#allocation4 + $0x4] ss:$16 sps:$4 sm:$0xff]  }
  0x69   :  { %450 = vmatprep.subr.bf16.mxu0 %v2863_v8  ;;  %v2914_v44 = vld [vmem:[#allocation2 + $0xb0] ss:$12 sps:$4 sm:$0xff]   ;;  %v101_v46 = vld [vmem:[%s3518_s0] sm:$0xff]  ;;  %v2897_v53 = vld [vmem:[#allocation2 + $0x16c] ss:$12 sps:$4 sm:$0xff]  }
  0x6a   :  { %2609 = vmatpush3.bf16.msra.mxu1 %v2904_v24  ;;  %v2892_v47 = vld [vmem:[#allocation2 + $0x138] ss:$12 sps:$4 sm:$0xff]   ;;  %v2893_v48 = vld [vmem:[#allocation2 + $0x154] ss:$12 sps:$4 sm:$0xff]   ;;  %v168_v50 = vpack.c.bf16 %v101_v46, %v101_v46  ;;  %v2895_v52 = vld [vmem:[#allocation2 + $0x150] ss:$12 sps:$4 sm:$0xff]  }
  0x6b   :  { %2610 = vmatprep.subr.bf16.mxu1 %v2905_v25  ;;  %v2915_v49 = vld [vmem:[#allocation4] ss:$16 sps:$4 sm:$0xff]   ;;  %v2923_v51 = vld [vmem:[#allocation4 + $0x24] ss:$16 sps:$4 sm:$0xff]   ;;  %v2920_v57 = vld [vmem:[#allocation4 + $0xc] ss:$16 sps:$4 sm:$0xff]  }
  0x6c   :  { %451 = vmatpush1.bf16.msra.mxu0 %v2865_v9  ;;  %v2921_v54 = vld [vmem:[#allocation4 + $0x20] ss:$16 sps:$4 sm:$0xff]   ;;  %v2929_v55 = vld [vmem:[#allocation4 + $0x44] ss:$16 sps:$4 sm:$0xff]   ;;  %v2918_v60 = vld [vmem:[#allocation4 + $0x8] ss:$16 sps:$4 sm:$0xff]  }
  0x6d   :  { %452 = vmatprep.subr.bf16.mxu0 %v2866_v10  ;;  %v2900_v56 = vld [vmem:[#allocation2 + $0x168] ss:$12 sps:$4 sm:$0xff]   ;;  %v2927_v58 = vld [vmem:[#allocation4 + $0x40] ss:$16 sps:$4 sm:$0xff]   ;;  %v2926_v61 = vld [vmem:[#allocation4 + $0x2c] ss:$16 sps:$4 sm:$0xff]  }
  0x6e   :  { %2611 = vmatpush3.bf16.msra.mxu1 %v2906_v28  ;;  %v2935_v59 = vld [vmem:[#allocation4 + $0x64] ss:$16 sps:$4 sm:$0xff]   ;;  %v2933_v62 = vld [vmem:[#allocation4 + $0x60] ss:$16 sps:$4 sm:$0xff]   ;;  %v2924_v0 = vld [vmem:[#allocation4 + $0x28] ss:$16 sps:$4 sm:$0xff]  }
  0x6f   :  { %2612 = vmatprep.subr.bf16.mxu1 %v2907_v29  ;;  %v2941_v63 = vld [vmem:[#allocation4 + $0x84] ss:$16 sps:$4 sm:$0xff]   ;;  %v2932_v1 = vld [vmem:[#allocation4 + $0x4c] ss:$16 sps:$4 sm:$0xff]   ;;  %v2939_v2 = vld [vmem:[#allocation4 + $0x80] ss:$16 sps:$4 sm:$0xff]  }
  0x70   :  { %453 = vmatpush1.bf16.msra.mxu0 %v2868_v11  ;;  %v2947_v3 = vld [vmem:[#allocation4 + $0xa4] ss:$16 sps:$4 sm:$0xff]   ;;  %v2930_v4 = vld [vmem:[#allocation4 + $0x48] ss:$16 sps:$4 sm:$0xff]   ;;  %v2938_v5 = vld [vmem:[#allocation4 + $0x6c] ss:$16 sps:$4 sm:$0xff]  }
  0x71   :  { %454 = vmatprep.subr.bf16.mxu0 %v2869_v12  ;;  %v2945_v6 = vld [vmem:[#allocation4 + $0xa0] ss:$16 sps:$4 sm:$0xff]   ;;  %v2936_v7 = vld [vmem:[#allocation4 + $0x68] ss:$16 sps:$4 sm:$0xff]   ;;  %v2953_v8 = vld [vmem:[#allocation4 + $0xc4] ss:$16 sps:$4 sm:$0xff]  }
  0x72   :  { %2613 = vmatpush3.bf16.msra.mxu1 %v2908_v32  ;;  %v2944_v9 = vld [vmem:[#allocation4 + $0x8c] ss:$16 sps:$4 sm:$0xff]   ;;  %v2951_v10 = vld [vmem:[#allocation4 + $0xc0] ss:$16 sps:$4 sm:$0xff]   ;;  %v2959_v11 = vld [vmem:[#allocation4 + $0xe4] ss:$16 sps:$4 sm:$0xff]  }
  0x73   :  { %2614 = vmatprep.subr.bf16.mxu1 %v2909_v33  ;;  %v2942_v12 = vld [vmem:[#allocation4 + $0x88] ss:$16 sps:$4 sm:$0xff]   ;;  %v2950_v13 = vld [vmem:[#allocation4 + $0xac] ss:$16 sps:$4 sm:$0xff]   ;;  %v2957_v14 = vld [vmem:[#allocation4 + $0xe0] ss:$16 sps:$4 sm:$0xff]  }
  0x74   :  { %455 = vmatpush1.bf16.msra.mxu0 %v2871_v15  ;;  %v2965_v15 = vld [vmem:[#allocation4 + $0x104] ss:$16 sps:$4 sm:$0xff]   ;;  %v2948_v16 = vld [vmem:[#allocation4 + $0xa8] ss:$16 sps:$4 sm:$0xff]   ;;  %v2963_v18 = vld [vmem:[#allocation4 + $0x100] ss:$16 sps:$4 sm:$0xff]  }
  0x75   :  { %456 = vmatprep.subr.bf16.mxu0 %v2872_v17  ;;  %v2956_v17 = vld [vmem:[#allocation4 + $0xcc] ss:$16 sps:$4 sm:$0xff]   ;;  %v2971_v19 = vld [vmem:[#allocation4 + $0x124] ss:$16 sps:$4 sm:$0xff]   ;;  %v2969_v22 = vld [vmem:[#allocation4 + $0x120] ss:$16 sps:$4 sm:$0xff]  }
  0x76   :  { %2615 = vmatpush3.bf16.msra.mxu1 %v2910_v36  ;;  %v2962_v21 = vld [vmem:[#allocation4 + $0xec] ss:$16 sps:$4 sm:$0xff]   ;;  %v2960_v24 = vld [vmem:[#allocation4 + $0xe8] ss:$16 sps:$4 sm:$0xff]   ;;  %v2999_v46 = vld [vmem:[#allocation4 + $0x1c0] ss:$16 sps:$4 sm:$0xff]  }
  0x77   :  { %2616 = vmatprep.subr.bf16.mxu1 %v2911_v37  ;;  %v2968_v25 = vld [vmem:[#allocation4 + $0x10c] ss:$16 sps:$4 sm:$0xff]   ;;  %v2966_v28 = vld [vmem:[#allocation4 + $0x108] ss:$16 sps:$4 sm:$0xff]  }
  0x78   :  { %457 = vmatpush1.bf16.msra.mxu0 %v2874_v20  ;;  %v2954_v20 = vld [vmem:[#allocation4 + $0xc8] ss:$16 sps:$4 sm:$0xff]   ;;  %v2974_v29 = vld [vmem:[#allocation4 + $0x12c] ss:$16 sps:$4 sm:$0xff]  }
  0x79   :  { %458 = vmatprep.subr.bf16.mxu0 %v2875_v23  ;;  %v2977_v23 = vld [vmem:[#allocation4 + $0x144] ss:$16 sps:$4 sm:$0xff]   ;;  %v2972_v32 = vld [vmem:[#allocation4 + $0x128] ss:$16 sps:$4 sm:$0xff]   ;;  %v2980_v33 = vld [vmem:[#allocation4 + $0x14c] ss:$16 sps:$4 sm:$0xff]  }
  0x7a   :  { %2617 = vmatpush3.bf16.msra.mxu1 %v2912_v40  ;;  %v2978_v36 = vld [vmem:[#allocation4 + $0x148] ss:$16 sps:$4 sm:$0xff]   ;;  %v2986_v37 = vld [vmem:[#allocation4 + $0x16c] ss:$16 sps:$4 sm:$0xff]  }
  0x7b   :  { %2618 = vmatprep.subr.bf16.mxu1 %v2913_v41  ;;  %v2992_v40 = vld [vmem:[#allocation4 + $0x18c] ss:$16 sps:$4 sm:$0xff]   ;;  %v2990_v41 = vld [vmem:[#allocation4 + $0x188] ss:$16 sps:$4 sm:$0xff]  }
  0x7c   :  { %459 = vmatpush1.bf16.msra.mxu0 %v2877_v26  ;;  %v2975_v26 = vld [vmem:[#allocation4 + $0x140] ss:$16 sps:$4 sm:$0xff]  }
  0x7d   :  { %460 = vmatprep.subr.bf16.mxu0 %v2878_v27  ;;  %v2983_v27 = vld [vmem:[#allocation4 + $0x164] ss:$16 sps:$4 sm:$0xff]  }
  0x7e   :  { %2619 = vmatpush3.bf16.msra.mxu1 %v2914_v44  ;;  %v3001_v44 = vld [vmem:[#allocation4 + $0x1c4] ss:$16 sps:$4 sm:$0xff]  }
  0x7f   :  { %1105 = vmatprep.subr.bf16.mxu1 %v2917_v45  ;;  %v3004_v45 = vld [vmem:[#allocation4 + $0x1cc] ss:$16 sps:$4 sm:$0xff]  }
  0x80   :  { %461 = vmatpush1.bf16.msra.mxu0 %v2880_v30  ;;  %v2981_v30 = vld [vmem:[#allocation4 + $0x160] ss:$16 sps:$4 sm:$0xff]  }
  0x81   :  { %462 = vmatprep.subr.bf16.mxu0 %v2881_v31  ;;  %516 = vmatmul.mubr.bf16.vlgmr.msra.gmra.mrb[0].mxu1 %v168_v50  ;;  %v2989_v31 = vld [vmem:[#allocation4 + $0x184] ss:$16 sps:$4 sm:$0xff]  }
  0x82   :  { %1106 = vmatpush1.bf16.msra.mxu1 %v2915_v49  ;;  %v3010_v49 = vld [vmem:[#allocation4 + $0x1ec] ss:$16 sps:$4 sm:$0xff]  }
  0x83   :  { %1107 = vmatprep.subr.bf16.mxu1 %v2923_v51  ;;  %v3008_v51 = vld [vmem:[#allocation4 + $0x1e8] ss:$16 sps:$4 sm:$0xff]  }
  0x84   :  { %463 = vmatpush1.bf16.msra.mxu0 %v2883_v34  ;;  %v2987_v34 = vld [vmem:[#allocation4 + $0x180] ss:$16 sps:$4 sm:$0xff]  }
  0x85   :  { %464 = vmatprep.subr.bf16.mxu0 %v2884_v35  ;;  %v2995_v35 = vld [vmem:[#allocation4 + $0x1a4] ss:$16 sps:$4 sm:$0xff]  }
  0x86   :  { %1108 = vmatpush1.bf16.msra.mxu1 %v2921_v54  ;;  %v171_v54 = vlaneseq }
  0x87   :  { %1109 = vmatprep.subr.bf16.mxu1 %v2929_v55 }
  0x88   :  { %465 = vmatpush1.bf16.msra.mxu0 %v2886_v38  ;;  %v2993_v38 = vld [vmem:[#allocation4 + $0x1a0] ss:$16 sps:$4 sm:$0xff]   ;;  %v3409_v55 = vshrl.u32 %v171_v54, 7  ;;  %v3064_v54 = vld [vmem:[#allocation6 + $0x28] sm:$0xff]  }
  0x89   :  { %466 = vmatprep.subr.bf16.mxu0 %v2887_v39  ;;  %v2984_v39 = vld [vmem:[#allocation4 + $0x168] ss:$16 sps:$4 sm:$0xff]  }
  0x8a   :  { %1110 = vmatpush1.bf16.msra.mxu1 %v2927_v58 }
  0x8b   :  { %1111 = vmatprep.subr.bf16.mxu1 %v2935_v59 }
  0x8c   :  { %467 = vmatpush1.bf16.msra.mxu0 %v2889_v42  ;;  %v2998_v42 = vld [vmem:[#allocation4 + $0x1ac] ss:$16 sps:$4 sm:$0xff]  }
  0x8d   :  { %468 = vmatprep.subr.bf16.mxu0 %v2890_v43  ;;  %v2996_v43 = vld [vmem:[#allocation4 + $0x1a8] ss:$16 sps:$4 sm:$0xff]  }
  0x8e   :  { %1112 = vmatpush1.bf16.msra.mxu1 %v2933_v62  ;;  %v167_v62 = vld [vmem:[%s3520_s2] sm:$0x7] }
  0x8f   :  { %1113 = vmatprep.subr.bf16.mxu1 %v2941_v63  ;;  %v177_v63 = vsub.s32 1, %v3409_v55 }
  0x90   :  { %469 = vmatpush1.bf16.msra.mxu0 %v2892_v47  ;;  %v3002_v47 = vld [vmem:[#allocation4 + $0x1c8] ss:$16 sps:$4 sm:$0xff]  }
  0x91   :  { %470 = vmatprep.subr.bf16.mxu0 %v2893_v48  ;;  %v3007_v48 = vld [vmem:[#allocation4 + $0x1e4] ss:$16 sps:$4 sm:$0xff]  }
  0x92   :  { %1114 = vmatpush1.bf16.msra.mxu1 %v2939_v2 }
  0x93   :  { %1115 = vmatprep.subr.bf16.mxu1 %v2947_v3 }
  0x94   :  { %471 = vmatpush1.bf16.msra.mxu0 %v2895_v52  ;;  %v3013_v52 = vld [vmem:[#allocation4 + $0x204] ss:$16 sps:$4 sm:$0xff]  }
  0x95   :  { %472 = vmatprep.subr.bf16.mxu0 %v2897_v53  ;;  %v3016_v53 = vld [vmem:[#allocation4 + $0x20c] ss:$16 sps:$4 sm:$0xff]  }
  0x96   :  { %1116 = vmatpush1.bf16.msra.mxu1 %v2945_v6 }
  0x97   :  { %1117 = vmatprep.subr.bf16.mxu1 %v2953_v8 }
  0x98   :  { %473 = vmatpush1.bf16.msra.mxu0 %v2900_v56 }
  0x99   :  { %1187 = vmatprep.subr.bf16.mxu0 %v2920_v57 }
  0x9a   :  { %1118 = vmatpush1.bf16.msra.mxu1 %v2951_v10 }
  0x9b   :  { %475 = vmatmul.mubr.bf16.vlgmr.msra.gmra.mrb[0].mxu0 %v168_v50  ;;  %1119 = vmatprep.subr.bf16.mxu1 %v2959_v11  ;;  %v3005_v50 = vld [vmem:[#allocation4 + $0x1e0] ss:$16 sps:$4 sm:$0xff]  }
  0x9c   :  { %1188 = vmatpush1.bf16.msra.mxu0 %v2918_v60  ;;  %v3011_v11 = vld [vmem:[#allocation4 + $0x200] ss:$16 sps:$4 sm:$0xff]  }
  0x9d   :  { %1189 = vmatprep.subr.bf16.mxu0 %v2926_v61  ;;  %v173_v61 = vsub.s32 0, %v3409_v55 }
  0x9e   :  { %1120 = vmatpush1.bf16.msra.mxu1 %v2957_v14  ;;  %v3019_v14 = vld [vmem:[#allocation4 + $0x224] ss:$16 sps:$4 sm:$0xff]  }
  0x9f   :  { %1121 = vmatprep.subr.bf16.mxu1 %v2965_v15  ;;  %v3022_v15 = vld [vmem:[#allocation4 + $0x22c] ss:$16 sps:$4 sm:$0xff]  }
  0xa0   :  { %1190 = vmatpush1.bf16.msra.mxu0 %v2924_v0  ;;  %v174_v0 = vrot.slane %v167_v62, %v173_v61  ;;  %v3073_v61 = vld [vmem:[#allocation7 + $0x20] ss:$16 sps:$4 sm:$0xff]  }
  0xa1   :  { %1191 = vmatprep.subr.bf16.mxu0 %v2932_v1  ;;  %v178_v1 = vrot.slane %v167_v62, %v177_v63  ;;  %v3079_v63 = vld [vmem:[#allocation7 + $0x40] ss:$16 sps:$4 sm:$0xff]  }
  0xa2   :  { %1122 = vmatpush1.bf16.msra.mxu1 %v2963_v18  ;;  %v3025_v18 = vld [vmem:[#allocation4 + $0x244] ss:$16 sps:$4 sm:$0xff]  }
  0xa3   :  { %1123 = vmatprep.subr.bf16.mxu1 %v2971_v19  ;;  %v3028_v19 = vld [vmem:[#allocation4 + $0x24c] ss:$16 sps:$4 sm:$0xff]  }
  0xa4   :  { %1192 = vmatpush1.bf16.msra.mxu0 %v2930_v4 }
  0xa5   :  { %1193 = vmatprep.subr.bf16.mxu0 %v2938_v5 }
  0xa6   :  { %1124 = vmatpush1.bf16.msra.mxu1 %v2969_v22  ;;  %v3026_v22 = vld [vmem:[#allocation4 + $0x248] ss:$16 sps:$4 sm:$0xff]  }
  0xa7   :  { %1125 = vmatprep.subr.bf16.mxu1 %v2977_v23  ;;  %v3031_v23 = vld [vmem:[#allocation4 + $0x264] ss:$16 sps:$4 sm:$0xff]  }
  0xa8   :  { %1194 = vmatpush1.bf16.msra.mxu0 %v2936_v7 }
  0xa9   :  { %1195 = vmatprep.subr.bf16.mxu0 %v2944_v9 }
  0xaa   :  { %1126 = vmatpush1.bf16.msra.mxu1 %v2975_v26  ;;  %v3032_v26 = vld [vmem:[#allocation4 + $0x268] ss:$16 sps:$4 sm:$0xff]  }
  0xab   :  { %1127 = vmatprep.subr.bf16.mxu1 %v2983_v27  ;;  %v3037_v27 = vld [vmem:[#allocation4 + $0x284] ss:$16 sps:$4 sm:$0xff]  }
  0xac   :  { %1196 = vmatpush1.bf16.msra.mxu0 %v2942_v12  ;;  %v3014_v12 = vld [vmem:[#allocation4 + $0x208] ss:$16 sps:$4 sm:$0xff]  }
  0xad   :  { %1197 = vmatprep.subr.bf16.mxu0 %v2950_v13 }
  0xae   :  { %1128 = vmatpush1.bf16.msra.mxu1 %v2981_v30  ;;  %v3035_v30 = vld [vmem:[#allocation4 + $0x280] ss:$16 sps:$4 sm:$0xff]  }
  0xaf   :  { %1129 = vmatprep.subr.bf16.mxu1 %v2989_v31  ;;  %v3038_v31 = vld [vmem:[#allocation4 + $0x288] ss:$16 sps:$4 sm:$0xff]  }
  0xb0   :  { %1198 = vmatpush1.bf16.msra.mxu0 %v2948_v16  ;;  %v3017_v16 = vld [vmem:[#allocation4 + $0x220] ss:$16 sps:$4 sm:$0xff]  }
  0xb1   :  { %1199 = vmatprep.subr.bf16.mxu0 %v2956_v17  ;;  %v3020_v17 = vld [vmem:[#allocation4 + $0x228] ss:$16 sps:$4 sm:$0xff]  }
  0xb2   :  { %1130 = vmatpush1.bf16.msra.mxu1 %v2987_v34 }
  0xb3   :  { %1131 = vmatprep.subr.bf16.mxu1 %v2995_v35  ;;  %v3041_v35 = vld [vmem:[#allocation4 + $0x2a0] ss:$16 sps:$4 sm:$0xff]  }
  0xb4   :  { %1200 = vmatpush1.bf16.msra.mxu0 %v2954_v20  ;;  %v3290_v20 = vmov 0  }
  0xb5   :  { %1201 = vmatprep.subr.bf16.mxu0 %v2962_v21  ;;  %v3023_v21 = vld [vmem:[#allocation4 + $0x240] ss:$16 sps:$4 sm:$0xff]  }
  0xb6   :  { %1132 = vmatpush1.bf16.msra.mxu1 %v2993_v38  ;;  %v3052_v38 = vld [vmem:[#allocation4 + $0x2cc] ss:$16 sps:$4 sm:$0xff]  }
  0xb7   :  { %1133 = vmatprep.subr.bf16.mxu1 %v3001_v44 }
  0xb8   :  { %1202 = vmatpush1.bf16.msra.mxu0 %v2960_v24  ;;  %v3034_v24 = vld [vmem:[#allocation4 + $0x26c] ss:$16 sps:$4 sm:$0xff]  }
  0xb9   :  { %1203 = vmatprep.subr.bf16.mxu0 %v2968_v25  ;;  %v3029_v25 = vld [vmem:[#allocation4 + $0x260] ss:$16 sps:$4 sm:$0xff]  }
  0xba   :  { %1134 = vmatpush1.bf16.msra.mxu1 %v2999_v46  ;;  %v3056_v46 = vld [vmem:[#allocation4 + $0x2e8] ss:$16 sps:$4 sm:$0xff]  }
  0xbb   :  { %1135 = vmatprep.subr.bf16.mxu1 %v3007_v48  ;;  %v3059_v48 = vld [vmem:[#allocation6] sm:$0xff]  }
  0xbc   :  { %1204 = vmatpush1.bf16.msra.mxu0 %v2966_v28  ;;  %v3040_v28 = vld [vmem:[#allocation4 + $0x28c] ss:$16 sps:$4 sm:$0xff]  }
  0xbd   :  { %1205 = vmatprep.subr.bf16.mxu0 %v2974_v29  ;;  %v181_v29 = vsub.s32 2, %v3409_v55  ;;  %v3065_v55 = vld [vmem:[#allocation6 + $0x30] sm:$0xff]  }
  0xbe   :  { %1136 = vmatpush1.bf16.msra.mxu1 %v3005_v50  ;;  %v3060_v50 = vld [vmem:[#allocation6 + $0x8] sm:$0xff]  }
  0xbf   :  { %1146 = vmatprep.subr.bf16.mxu1 %v3013_v52  ;;  %v182_v34 = vrot.slane %v167_v62, %v181_v29  ;;  %v3062_v52 = vld [vmem:[#allocation6 + $0x18] sm:$0xff]   ;;  %v3081_v62 = vld [vmem:[#allocation7 + $0x44] ss:$16 sps:$4 sm:$0xff]  }
  0xc0   :  { %1206 = vmatpush1.bf16.msra.mxu0 %v2972_v32  ;;  %v3043_v32 = vld [vmem:[#allocation4 + $0x2a4] ss:$16 sps:$4 sm:$0xff]   ;;  %v3094_v29 = vld [vmem:[#allocation7 + $0x88] ss:$16 sps:$4 sm:$0xff]  }
  0xc1   :  { %1207 = vmatprep.subr.bf16.mxu0 %v2980_v33  ;;  %v3046_v33 = vld [vmem:[#allocation4 + $0x2ac] ss:$16 sps:$4 sm:$0xff]  }
  0xc4   :  { %1208 = vmatpush1.bf16.msra.mxu0 %v2978_v36  ;;  %v3044_v36 = vld [vmem:[#allocation4 + $0x2a8] ss:$16 sps:$4 sm:$0xff]  }
  0xc5   :  { %1209 = vmatprep.subr.bf16.mxu0 %v2986_v37  ;;  %v3049_v37 = vld [vmem:[#allocation4 + $0x2c4] ss:$16 sps:$4 sm:$0xff]  }
  0xc8   :  { %1210 = vmatpush1.bf16.msra.mxu0 %v2984_v39 }
  0xc9   :  { %1211 = vmatprep.subr.bf16.mxu0 %v2992_v40  ;;  %v3047_v40 = vld [vmem:[#allocation4 + $0x2c0] ss:$16 sps:$4 sm:$0xff]  }
  0xcc   :  { %1212 = vmatpush1.bf16.msra.mxu0 %v2990_v41  ;;  %v3050_v41 = vld [vmem:[#allocation4 + $0x2c8] ss:$16 sps:$4 sm:$0xff]  }
  0xcd   :  { %1213 = vmatprep.subr.bf16.mxu0 %v2998_v42  ;;  %v3055_v42 = vld [vmem:[#allocation4 + $0x2e4] ss:$16 sps:$4 sm:$0xff]  }
  0xd0   :  { %1214 = vmatpush1.bf16.msra.mxu0 %v2996_v43  ;;  %v3058_v43 = vld [vmem:[#allocation4 + $0x2ec] ss:$16 sps:$4 sm:$0xff]  }
  0xd1   :  { %1215 = vmatprep.subr.bf16.mxu0 %v3004_v45  ;;  %v3053_v45 = vld [vmem:[#allocation4 + $0x2e0] ss:$16 sps:$4 sm:$0xff]  }
  0xd4   :  { %1216 = vmatpush1.bf16.msra.mxu0 %v3002_v47 }
  0xd5   :  { %1217 = vmatprep.subr.bf16.mxu0 %v3010_v49  ;;  %v3291_v49 = vmov 0.0  }
  0xd8   :  { %1218 = vmatpush1.bf16.msra.mxu0 %v3008_v51  ;;  %v3061_v51 = vld [vmem:[#allocation6 + $0x10] sm:$0xff]  }
  0xd9   :  { %1228 = vmatprep.subr.bf16.mxu0 %v3016_v53  ;;  %v3063_v53 = vld [vmem:[#allocation6 + $0x20] sm:$0xff]  }
 0x154   :  { %v2620_v56 = vpop.f32.mrb[0].mxu1 }
 0x155   :  { %v2621_v57 = vpop.f32.mrb[1].mxu1 }
 0x156   :  { %v3411_v58 = vadd.f32 %v2621_v57, %v2620_v56  ;;  %v2623_v59 = vpop.f32.mrb[2].mxu1  ;;  %v3066_v56 = vld [vmem:[#allocation6 + $0x38] sm:$0xff]   ;;  %v3067_v57 = vld [vmem:[#allocation7] ss:$16 sps:$4 sm:$0xff]  }
 0x157   :  { %v2624_v60 = vpop.f32.mrb[3].mxu1  ;;  %v3072_v59 = vld [vmem:[#allocation7 + $0xc] ss:$16 sps:$4 sm:$0xff]  }
 0x158   :  { %v518_v39 = vadd.f32 %v3411_v58, %v182_v34  ;;  %v3069_v58 = vld [vmem:[#allocation7 + $0x4] ss:$16 sps:$4 sm:$0xff]   ;;  %v3114_v34 = vld [vmem:[#allocation7 + $0xec] ss:$16 sps:$4 sm:$0xff]  }
 0x159   :  { %v3075_v60 = vld [vmem:[#allocation7 + $0x24] ss:$16 sps:$4 sm:$0xff]  }
 0x15a   :  { %v525_v44 = vmax.f32 %v518_v39, 0.0 }
 0x15c   :  { %v624_v47 = vpack.c.bf16 %v525_v44, %v525_v44  ;;  %v3115_v44 = vld [vmem:[#allocation9] sm:$0xff]  }
 0x16e   :  { %v476_v2 = vpop.f32.mrb[0].mxu0 }
 0x16f   :  { %v477_v3 = vadd.f32 %v476_v2, %v174_v0  ;;  %v478_v4 = vpop.f32.mrb[1].mxu0  ;;  %v3087_v0 = vld [vmem:[#allocation7 + $0x64] ss:$16 sps:$4 sm:$0xff]  }
 0x170   :  { %v479_v5 = vadd.f32 %v478_v4, %v178_v1  ;;  %v480_v6 = vpop.f32.mrb[2].mxu0  ;;  %v3085_v1 = vld [vmem:[#allocation7 + $0x60] ss:$16 sps:$4 sm:$0xff]   ;;  %v3093_v2 = vld [vmem:[#allocation7 + $0x84] ss:$16 sps:$4 sm:$0xff]  }
 0x171   :  { %v523_v7 = vmax.f32 %v477_v3, 0.0  ;;  %v481_v8 = vpop.f32.mrb[3].mxu0  ;;  %v3091_v3 = vld [vmem:[#allocation7 + $0x80] ss:$16 sps:$4 sm:$0xff]   ;;  %v3099_v4 = vld [vmem:[#allocation7 + $0xa4] ss:$16 sps:$4 sm:$0xff]  }
 0x172   :  { %v524_v9 = vmax.f32 %v479_v5, 0.0  ;;  %v3097_v5 = vld [vmem:[#allocation7 + $0xa0] ss:$16 sps:$4 sm:$0xff]   ;;  %v3105_v6 = vld [vmem:[#allocation7 + $0xc4] ss:$16 sps:$4 sm:$0xff]  }
 0x173   :  { %v622_v13 = vpack.c.bf16 %v523_v7, %v523_v7  ;;  %v3103_v7 = vld [vmem:[#allocation7 + $0xc0] ss:$16 sps:$4 sm:$0xff]  }
 0x174   :  { %v623_v10 = vpack.c.bf16 %v524_v9, %v524_v9 }
 0x176   :  { %1137 = vmatprep.mubr.bf16.mxu1 %v623_v10  ;;  %1219 = vmatprep.mubr.bf16.mxu0 %v623_v10 }
 0x177   :  { %1138 = vmatmul.mubr.bf16.vlgmr.msra.gmra.mrb[4].mxu1 %v622_v13  ;;  %1220 = vmatmul.mubr.bf16.vlgmr.msra.gmra.mrb[4].mxu0 %v622_v13 }
 0x178   :  { %1147 = vmatpush1.bf16.msra.mxu1 %v3011_v11  ;;  %1229 = vmatpush1.bf16.msra.mxu0 %v3014_v12 }
 0x179   :  { %1148 = vmatprep.subr.bf16.mxu1 %v3019_v14  ;;  %1230 = vmatprep.subr.bf16.mxu0 %v3022_v15 }
 0x17a   :  { %1178 = vmatprep.mubr.bf16.mxu1 %v3290_v20  ;;  %1260 = vmatprep.mubr.bf16.mxu0 %v3290_v20 }
 0x17c   :  { %1149 = vmatpush1.bf16.msra.mxu1 %v3017_v16  ;;  %1231 = vmatpush1.bf16.msra.mxu0 %v3020_v17 }
 0x17d   :  { %1150 = vmatprep.subr.bf16.mxu1 %v3025_v18  ;;  %1232 = vmatprep.subr.bf16.mxu0 %v3028_v19  ;;  %v3070_v19 = vld [vmem:[#allocation7 + $0x8] ss:$16 sps:$4 sm:$0xff]  }
 0x180   :  { %1151 = vmatpush1.bf16.msra.mxu1 %v3023_v21  ;;  %1233 = vmatpush1.bf16.msra.mxu0 %v3026_v22  ;;  %v3078_v22 = vld [vmem:[#allocation7 + $0x2c] ss:$16 sps:$4 sm:$0xff]  }
 0x181   :  { %1152 = vmatprep.subr.bf16.mxu1 %v3031_v23  ;;  %1234 = vmatprep.subr.bf16.mxu0 %v3034_v24  ;;  %v3076_v23 = vld [vmem:[#allocation7 + $0x28] ss:$16 sps:$4 sm:$0xff]   ;;  %v3084_v24 = vld [vmem:[#allocation7 + $0x4c] ss:$16 sps:$4 sm:$0xff]  }
 0x184   :  { %1153 = vmatpush1.bf16.msra.mxu1 %v3029_v25  ;;  %1235 = vmatpush1.bf16.msra.mxu0 %v3032_v26  ;;  %v3082_v25 = vld [vmem:[#allocation7 + $0x48] ss:$16 sps:$4 sm:$0xff]   ;;  %v3090_v26 = vld [vmem:[#allocation7 + $0x6c] ss:$16 sps:$4 sm:$0xff]  }
 0x185   :  { %1154 = vmatprep.subr.bf16.mxu1 %v3037_v27  ;;  %1236 = vmatprep.subr.bf16.mxu0 %v3040_v28  ;;  %v3088_v27 = vld [vmem:[#allocation7 + $0x68] ss:$16 sps:$4 sm:$0xff]   ;;  %v3096_v28 = vld [vmem:[#allocation7 + $0x8c] ss:$16 sps:$4 sm:$0xff]  }
 0x188   :  { %1155 = vmatpush1.bf16.msra.mxu1 %v3035_v30  ;;  %1237 = vmatpush1.bf16.msra.mxu0 %v3038_v31  ;;  %v3102_v30 = vld [vmem:[#allocation7 + $0xac] ss:$16 sps:$4 sm:$0xff]   ;;  %v3100_v31 = vld [vmem:[#allocation7 + $0xa8] ss:$16 sps:$4 sm:$0xff]  }
 0x189   :  { %1156 = vmatprep.subr.bf16.mxu1 %v3043_v32  ;;  %1238 = vmatprep.subr.bf16.mxu0 %v3046_v33  ;;  %v3108_v32 = vld [vmem:[#allocation7 + $0xcc] ss:$16 sps:$4 sm:$0xff]   ;;  %v3111_v33 = vld [vmem:[#allocation7 + $0xe4] ss:$16 sps:$4 sm:$0xff]  }
 0x18c   :  { %1157 = vmatpush1.bf16.msra.mxu1 %v3041_v35  ;;  %1239 = vmatpush1.bf16.msra.mxu0 %v3044_v36  ;;  %v3109_v35 = vld [vmem:[#allocation7 + $0xe0] ss:$16 sps:$4 sm:$0xff]   ;;  %v3112_v36 = vld [vmem:[#allocation7 + $0xe8] ss:$16 sps:$4 sm:$0xff]  }
 0x18d   :  { %1158 = vmatprep.subr.bf16.mxu1 %v3049_v37  ;;  %1240 = vmatprep.subr.bf16.mxu0 %v3052_v38  ;;  %v2504_v37 = vld [vmem:[%s3523_s5] ss:$0 sm:$0xff] }
 0x190   :  { %1159 = vmatpush1.bf16.msra.mxu1 %v3047_v40  ;;  %1241 = vmatpush1.bf16.msra.mxu0 %v3050_v41 }
 0x191   :  { %1160 = vmatprep.subr.bf16.mxu1 %v3055_v42  ;;  %1242 = vmatprep.subr.bf16.mxu0 %v3058_v43 }
 0x194   :  { %1161 = vmatpush1.bf16.msra.mxu1 %v3053_v45  ;;  %1243 = vmatpush1.bf16.msra.mxu0 %v3056_v46  ;;  %v3116_v46 = vld [vmem:[#allocation9 + $0x8] sm:$0xff]  }
 0x195   :  { %2689 = vmatprep.subr.bf16.mxu1 %v3291_v49  ;;  %1578 = vmatprep.subr.bf16.mxu0 %v3069_v58  ;;  %v3127_v58 = vld [vmem:[#allocation9 + $0x60] sm:$0xff]  }
 0x197   :  { %1179 = vmatmul.mubr.bf16.vlgmr.msra.gmra.mrb[4].mxu1 %v624_v47  ;;  %1261 = vmatmul.mubr.bf16.vlgmr.msra.gmra.mrb[4].mxu0 %v624_v47  ;;  %v3117_v47 = vld [vmem:[#allocation9 + $0x10] sm:$0xff]  }
 0x198   :  { %2690 = vmatpush3.bf16.msra.mxu1 %v3059_v48  ;;  %1610 = vmatprep.mubr.bf16.mxu0 %v3290_v20  ;;  %v3118_v48 = vld [vmem:[#allocation9 + $0x18] sm:$0xff]  }
 0x199   :  { %2691 = vmatprep.subr.bf16.mxu1 %v3291_v49  ;;  %2705 = vmatprep.mubr.msk.bf16.mxu1 %vm3292_vm0, %v3291_v49 }
 0x19a   :  { %1579 = vmatpush1.bf16.msra.mxu0 %v3067_v57  ;;  %v3126_v57 = vld [vmem:[#allocation9 + $0x58] sm:$0xff]  }
 0x19b   :  { %1580 = vmatprep.subr.bf16.mxu0 %v3075_v60 }
 0x19c   :  { %2692 = vmatpush3.bf16.msra.mxu1 %v3060_v50  ;;  %v3119_v50 = vld [vmem:[#allocation9 + $0x20] sm:$0xff]  }
 0x19d   :  { %2693 = vmatprep.subr.bf16.mxu1 %v3291_v49 }
 0x19e   :  { %1581 = vmatpush1.bf16.msra.mxu0 %v3073_v61 }
 0x19f   :  { %1582 = vmatprep.subr.bf16.mxu0 %v3081_v62 }
 0x1a0   :  { %2694 = vmatpush3.bf16.msra.mxu1 %v3061_v51  ;;  %v3120_v51 = vld [vmem:[#allocation9 + $0x28] sm:$0xff]  }
 0x1a1   :  { %2695 = vmatprep.subr.bf16.mxu1 %v3291_v49 }
 0x1a2   :  { %1583 = vmatpush1.bf16.msra.mxu0 %v3079_v63 }
 0x1a3   :  { %1584 = vmatprep.subr.bf16.mxu0 %v3087_v0 }
 0x1a4   :  { %2696 = vmatpush3.bf16.msra.mxu1 %v3062_v52  ;;  %v3121_v52 = vld [vmem:[#allocation9 + $0x30] sm:$0xff]  }
 0x1a5   :  { %2697 = vmatprep.subr.bf16.mxu1 %v3291_v49 }
 0x1a6   :  { %1585 = vmatpush1.bf16.msra.mxu0 %v3085_v1 }
 0x1a7   :  { %1586 = vmatprep.subr.bf16.mxu0 %v3093_v2 }
 0x1a8   :  { %2698 = vmatpush3.bf16.msra.mxu1 %v3063_v53  ;;  %v3122_v53 = vld [vmem:[#allocation9 + $0x38] sm:$0xff]  }
 0x1a9   :  { %2699 = vmatprep.subr.bf16.mxu1 %v3291_v49 }
 0x1aa   :  { %1587 = vmatpush1.bf16.msra.mxu0 %v3091_v3 }
 0x1ab   :  { %1588 = vmatprep.subr.bf16.mxu0 %v3099_v4 }
 0x1ac   :  { %2700 = vmatpush3.bf16.msra.mxu1 %v3064_v54  ;;  %v3123_v54 = vld [vmem:[#allocation9 + $0x40] sm:$0xff]  }
 0x1ad   :  { %2701 = vmatprep.subr.bf16.mxu1 %v3291_v49 }
 0x1ae   :  { %1589 = vmatpush1.bf16.msra.mxu0 %v3097_v5 }
 0x1af   :  { %1590 = vmatprep.subr.bf16.mxu0 %v3105_v6 }
 0x1b0   :  { %2702 = vmatpush3.bf16.msra.mxu1 %v3065_v55  ;;  %v3124_v55 = vld [vmem:[#allocation9 + $0x48] sm:$0xff]  }
 0x1b1   :  { %2703 = vmatprep.subr.bf16.mxu1 %v3291_v49 }
 0x1b2   :  { %1591 = vmatpush1.bf16.msra.mxu0 %v3103_v7 }
 0x1b3   :  { %1592 = vmatprep.subr.bf16.mxu0 %v3111_v33 }
 0x1b4   :  { %2704 = vmatpush3.bf16.msra.mxu1 %v3066_v56  ;;  %v3125_v56 = vld [vmem:[#allocation9 + $0x50] sm:$0xff]  }
 0x1b5   :  { %1619 = vmatprep.subr.bf16.mxu1 %v3072_v59  ;;  %v3128_v59 = vld [vmem:[#allocation9 + $0x68] sm:$0xff]  }
 0x1b6   :  { %1593 = vmatpush1.bf16.msra.mxu0 %v3109_v35 }
 0x1b7   :  { %2709 = vmatprep.subr.bf16.mxu0 %v3291_v49 }
 0x26a   :  { %v1180_v8 = vpop.f32.mrb[4].mxu1  ;;  %v1262_v9 = vpop.f32.mrb[4].mxu0 }
 0x26b   :  { %v1182_v10 = vpop.f32.mrb[5].mxu1  ;;  %v1264_v11 = vpop.f32.mrb[5].mxu0 }
 0x26c   :  { %v1269_v12 = vmax.f32 %v1180_v8, %v1182_v10  ;;  %v1270_v13 = vmax.f32 %v1262_v9, %v1264_v11  ;;  %v1184_v14 = vpop.f32.mrb[6].mxu1  ;;  %v1266_v15 = vpop.f32.mrb[6].mxu0  ;;  %v3129_v8 = vld [vmem:[#allocation9 + $0x70] sm:$0xff]   ;;  %v3130_v9 = vld [vmem:[#allocation9 + $0x78] sm:$0xff]   ;;  %v3131_v10 = vld [vmem:[#allocation9 + $0x80] sm:$0xff]  }
 0x26d   :  { %v1185_v16 = vpop.f32.mrb[7].mxu1  ;;  %v1267_v17 = vpop.f32.mrb[7].mxu0  ;;  %v3132_v11 = vld [vmem:[#allocation9 + $0x88] sm:$0xff]   ;;  %v3135_v14 = vld [vmem:[#allocation9 + $0xa0] sm:$0xff]  }
 0x26e   :  { %v1271_v18 = vmax.f32 %v1269_v12, %v1270_v13  ;;  %v3133_v12 = vld [vmem:[#allocation9 + $0x90] sm:$0xff]   ;;  %v3134_v13 = vld [vmem:[#allocation9 + $0x98] sm:$0xff]   ;;  %v3136_v15 = vld [vmem:[#allocation9 + $0xa8] sm:$0xff]  }
 0x26f   :  { %v2545_v16 = vld [vmem:[%s3526_s8] ss:$0 sm:$0xff] }
 0x270   :  { %v1289_v21 = vpack.c.bf16 %v1271_v18, %v1271_v18 }
 0x272   :  { %2706 = vmatmul.mubr.bf16.vlgmr.msra.gmra.mrb[8].mxu1 %v1289_v21 }
 0x273   :  { %1620 = vmatpush1.bf16.msra.mxu1 %v3070_v19  ;;  %1651 = vmatprep.mubr.bf16.mxu1 %v3290_v20  ;;  %v3106_v20 = vld [vmem:[#allocation7 + $0xc8] ss:$16 sps:$4 sm:$0xff]  }
 0x274   :  { %1621 = vmatprep.subr.bf16.mxu1 %v3078_v22 }
 0x277   :  { %1622 = vmatpush1.bf16.msra.mxu1 %v3076_v23 }
 0x278   :  { %1623 = vmatprep.subr.bf16.mxu1 %v3084_v24 }
 0x27b   :  { %1624 = vmatpush1.bf16.msra.mxu1 %v3082_v25  ;;  %v3137_v25 = vld [vmem:[#allocation9 + $0xb0] sm:$0xff]  }
 0x27c   :  { %1625 = vmatprep.subr.bf16.mxu1 %v3090_v26  ;;  %v3138_v26 = vld [vmem:[#allocation9 + $0xb8] sm:$0xff]  }
 0x27f   :  { %1626 = vmatpush1.bf16.msra.mxu1 %v3088_v27  ;;  %v3139_v27 = vld [vmem:[#allocation9 + $0xc0] sm:$0xff]  }
 0x280   :  { %1627 = vmatprep.subr.bf16.mxu1 %v3096_v28  ;;  %v3140_v28 = vld [vmem:[#allocation9 + $0xc8] sm:$0xff]  }
 0x283   :  { %1628 = vmatpush1.bf16.msra.mxu1 %v3094_v29  ;;  %v3141_v29 = vld [vmem:[#allocation9 + $0xd0] sm:$0xff]  }
 0x284   :  { %1629 = vmatprep.subr.bf16.mxu1 %v3102_v30  ;;  %v3142_v30 = vld [vmem:[#allocation9 + $0xd8] sm:$0xff]  }
 0x287   :  { %1630 = vmatpush1.bf16.msra.mxu1 %v3100_v31  ;;  %v3143_v31 = vld [vmem:[#allocation9 + $0xe0] sm:$0xff]  }
 0x288   :  { %1631 = vmatprep.subr.bf16.mxu1 %v3108_v32  ;;  %v3144_v32 = vld [vmem:[#allocation9 + $0xe8] sm:$0xff]  }
 0x28b   :  { %1632 = vmatpush1.bf16.msra.mxu1 %v3106_v20  ;;  %v2555_v20 = vld [vmem:[%s3526_s8 + $0x1] ss:$0 sm:$0xff] }
 0x28c   :  { %1633 = vmatprep.subr.bf16.mxu1 %v3114_v34 }
 0x28f   :  { %1634 = vmatpush1.bf16.msra.mxu1 %v3112_v36 }
 0x290   :  { %2729 = vmatprep.subr.bf16.mxu1 %v3291_v49 }
 0x345   :  { %v1378_v38 = vpop.f32.mrb[8].mxu1 }
 0x346   :  { %v1379_v39 = vadd.f32 %v2504_v37, %v1378_v38  ;;  %v2707_v40 = vpop.f32.mrb[9].mxu1 }
 0x347   :  { %v1381_v41 = vpop.f32.mrb[10].mxu1  ;;  %v3145_v40 = vld [vmem:[#allocation9 + $0xf0] sm:$0xff]  }
 0x348   :  { %v1384_v42 = vmax.f32 %v1379_v39, 0.0  ;;  %v2708_v43 = vpop.f32.mrb[11].mxu1  ;;  %v3146_v41 = vld [vmem:[#allocation9 + $0xf8] sm:$0xff]  }
 0x349   :  { %v3148_v43 = vld [vmem:[#allocation9 + $0x108] sm:$0xff]  }
 0x34a   :  { %v1417_v45 = vpack.c.bf16 %v1384_v42, %v1384_v42  ;;  %v3147_v42 = vld [vmem:[#allocation9 + $0x100] sm:$0xff]  }
 0x34c   :  { %1611 = vmatmul.mubr.bf16.vlgmr.msra.gmra.mrb[8].mxu0 %v1417_v45  ;;  %1652 = vmatmul.mubr.bf16.vlgmr.msra.gmra.mrb[12].mxu1 %v1417_v45  ;;  %v3150_v45 = vld [vmem:[#allocation9 + $0x118] sm:$0xff]  }
 0x34d   :  { %2710 = vmatpush3.bf16.msra.mxu0 %v3115_v44  ;;  %2725 = vmatprep.mubr.msk.bf16.mxu0 %vm3292_vm0, %v3291_v49  ;;  %v3149_v44 = vld [vmem:[#allocation9 + $0x110] sm:$0xff]  }
 0x34e   :  { %2711 = vmatprep.subr.bf16.mxu0 %v3291_v49  ;;  %2745 = vmatprep.mubr.msk.bf16.mxu1 %vm3292_vm0, %v3291_v49 }
 0x34f   :  { %2730 = vmatpush3.bf16.msra.mxu1 %v3123_v54 }
 0x350   :  { %2731 = vmatprep.subr.bf16.mxu1 %v3291_v49 }
 0x351   :  { %2712 = vmatpush3.bf16.msra.mxu0 %v3116_v46  ;;  %v3151_v46 = vld [vmem:[#allocation9 + $0x120] sm:$0xff]  }
 0x352   :  { %2713 = vmatprep.subr.bf16.mxu0 %v3291_v49 }
 0x353   :  { %2732 = vmatpush3.bf16.msra.mxu1 %v3124_v55 }
 0x354   :  { %2733 = vmatprep.subr.bf16.mxu1 %v3291_v49 }
 0x355   :  { %2714 = vmatpush3.bf16.msra.mxu0 %v3117_v47  ;;  %v3152_v47 = vld [vmem:[#allocation9 + $0x128] sm:$0xff]  }
 0x356   :  { %2715 = vmatprep.subr.bf16.mxu0 %v3291_v49 }
 0x357   :  { %2734 = vmatpush3.bf16.msra.mxu1 %v3125_v56 }
 0x358   :  { %2735 = vmatprep.subr.bf16.mxu1 %v3291_v49 }
 0x359   :  { %2716 = vmatpush3.bf16.msra.mxu0 %v3118_v48  ;;  %v2565_v48 = vld [vmem:[%s3526_s8 + $0x2] ss:$0 sm:$0xff] }
 0x35a   :  { %2717 = vmatprep.subr.bf16.mxu0 %v3291_v49 }
 0x35b   :  { %2736 = vmatpush3.bf16.msra.mxu1 %v3126_v57  ;;  %v3153_v57 = vld [vmem:[#allocation9 + $0x130] sm:$0xff]  }
 0x35c   :  { %2737 = vmatprep.subr.bf16.mxu1 %v3291_v49 }
 0x35d   :  { %2718 = vmatpush3.bf16.msra.mxu0 %v3119_v50 }
 0x35e   :  { %2719 = vmatprep.subr.bf16.mxu0 %v3291_v49 }
 0x35f   :  { %2738 = vmatpush3.bf16.msra.mxu1 %v3127_v58  ;;  %v3154_v58 = vld [vmem:[#allocation9 + $0x138] sm:$0xff]  }
 0x360   :  { %2739 = vmatprep.subr.bf16.mxu1 %v3291_v49 }
 0x361   :  { %2720 = vmatpush3.bf16.msra.mxu0 %v3120_v51 }
 0x362   :  { %2721 = vmatprep.subr.bf16.mxu0 %v3291_v49 }
 0x363   :  { %2740 = vmatpush3.bf16.msra.mxu1 %v3128_v59  ;;  %v3155_v59 = vld [vmem:[#allocation9 + $0x140] sm:$0xff]  }
 0x364   :  { %2741 = vmatprep.subr.bf16.mxu1 %v3291_v49 }
 0x365   :  { %2722 = vmatpush3.bf16.msra.mxu0 %v3121_v52 }
 0x366   :  { %2723 = vmatprep.subr.bf16.mxu0 %v3291_v49 }
 0x367   :  { %2742 = vmatpush3.bf16.msra.mxu1 %v3129_v8 }
 0x368   :  { %2743 = vmatprep.subr.bf16.mxu1 %v3291_v49 }
 0x369   :  { %2724 = vmatpush3.bf16.msra.mxu0 %v3122_v53 }
 0x36a   :  { %2749 = vmatprep.subr.bf16.mxu0 %v3291_v49 }
 0x36b   :  { %2744 = vmatpush3.bf16.msra.mxu1 %v3130_v9  ;;  %v3161_v9 = vld [vmem:[#allocation9 + $0x170] sm:$0xff]  }
 0x36c   :  { %2769 = vmatprep.subr.bf16.mxu1 %v3291_v49 }
 0x41f   :  { %v1612_v60 = vpop.f32.mrb[8].mxu0  ;;  %v1653_v61 = vpop.f32.mrb[12].mxu1 }
 0x420   :  { %v1614_v62 = vpop.f32.mrb[9].mxu0  ;;  %v1655_v63 = vpop.f32.mrb[13].mxu1 }
 0x421   :  { %v1660_v0 = vmax.f32 %v1612_v60, %v1614_v62  ;;  %v1661_v1 = vmax.f32 %v1653_v61, %v1655_v63  ;;  %v1616_v2 = vpop.f32.mrb[10].mxu0  ;;  %v1657_v3 = vpop.f32.mrb[14].mxu1  ;;  %v3156_v60 = vld [vmem:[#allocation9 + $0x148] sm:$0xff]   ;;  %v3157_v61 = vld [vmem:[#allocation9 + $0x150] sm:$0xff]   ;;  %v3158_v62 = vld [vmem:[#allocation9 + $0x158] sm:$0xff]  }
 0x422   :  { %v1617_v4 = vpop.f32.mrb[11].mxu0  ;;  %v1658_v5 = vpop.f32.mrb[15].mxu1  ;;  %v3159_v63 = vld [vmem:[#allocation9 + $0x160] sm:$0xff]  }
 0x423   :  { %v1662_v6 = vmax.f32 %v1660_v0, %v1661_v1  ;;  %v3160_v0 = vld [vmem:[#allocation9 + $0x168] sm:$0xff]   ;;  %v2575_v1 = vld [vmem:[%s3526_s8 + $0x3] ss:$0 sm:$0xff] }
 0x425   :  { %v1680_v7 = vpack.c.bf16 %v1662_v6, %v1662_v6 }
 0x427   :  { %2726 = vmatmul.mubr.bf16.vlgmr.msra.gmra.mrb[12].mxu0 %v1680_v7 }
 0x428   :  { %2765 = vmatprep.mubr.msk.bf16.mxu0 %vm3292_vm0, %v3291_v49  ;;  %2750 = vmatpush3.bf16.msra.mxu0 %v3131_v10  ;;  %v3162_v10 = vld [vmem:[#allocation9 + $0x178] sm:$0xff]  }
 0x429   :  { %2751 = vmatprep.subr.bf16.mxu0 %v3291_v49 }
 0x42c   :  { %2752 = vmatpush3.bf16.msra.mxu0 %v3132_v11  ;;  %v2585_v11 = vld [vmem:[%s3526_s8 + $0x4] ss:$0 sm:$0xff] }
 0x42d   :  { %2753 = vmatprep.subr.bf16.mxu0 %v3291_v49 }
 0x430   :  { %2754 = vmatpush3.bf16.msra.mxu0 %v3133_v12 }
 0x431   :  { %2755 = vmatprep.subr.bf16.mxu0 %v3291_v49 }
 0x434   :  { %2756 = vmatpush3.bf16.msra.mxu0 %v3134_v13 }
 0x435   :  { %2757 = vmatprep.subr.bf16.mxu0 %v3291_v49 }
 0x438   :  { %2758 = vmatpush3.bf16.msra.mxu0 %v3135_v14 }
 0x439   :  { %2759 = vmatprep.subr.bf16.mxu0 %v3291_v49 }
 0x43c   :  { %2760 = vmatpush3.bf16.msra.mxu0 %v3136_v15 }
 0x43d   :  { %2761 = vmatprep.subr.bf16.mxu0 %v3291_v49 }
 0x440   :  { %2762 = vmatpush3.bf16.msra.mxu0 %v3137_v25 }
 0x441   :  { %2763 = vmatprep.subr.bf16.mxu0 %v3291_v49 }
 0x444   :  { %2764 = vmatpush3.bf16.msra.mxu0 %v3138_v26 }
 0x445   :  { %2789 = vmatprep.subr.bf16.mxu0 %v3291_v49 }
 0x4fa   :  { %v1769_v17 = vpop.f32.mrb[12].mxu0 }
 0x4fb   :  { %v1770_v18 = vadd.f32 %v2545_v16, %v1769_v17  ;;  %v2727_v19 = vpop.f32.mrb[13].mxu0 }
 0x4fc   :  { %v1772_v21 = vpop.f32.mrb[14].mxu0  ;;  %v2595_v19 = vld [vmem:[%s3526_s8 + $0x5] ss:$0 sm:$0xff] }
 0x4fd   :  { %v1775_v22 = vmax.f32 %v1770_v18, 0.0  ;;  %v2728_v23 = vpop.f32.mrb[15].mxu0 }
 0x4ff   :  { %v1795_v24 = vpack.c.bf16 %v1775_v22, %v1775_v22 }
 0x501   :  { %2746 = vmatmul.mubr.bf16.vlgmr.msra.gmra.mrb[16].mxu1 %v1795_v24 }
 0x502   :  { %2785 = vmatprep.mubr.msk.bf16.mxu1 %vm3292_vm0, %v3291_v49  ;;  %2770 = vmatpush3.bf16.msra.mxu1 %v3139_v27 }
 0x503   :  { %2771 = vmatprep.subr.bf16.mxu1 %v3291_v49 }
 0x506   :  { %2772 = vmatpush3.bf16.msra.mxu1 %v3140_v28 }
 0x507   :  { %2773 = vmatprep.subr.bf16.mxu1 %v3291_v49 }
 0x50a   :  { %2774 = vmatpush3.bf16.msra.mxu1 %v3141_v29 }
 0x50b   :  { %2775 = vmatprep.subr.bf16.mxu1 %v3291_v49 }
 0x50e   :  { %2776 = vmatpush3.bf16.msra.mxu1 %v3142_v30 }
 0x50f   :  { %2777 = vmatprep.subr.bf16.mxu1 %v3291_v49 }
 0x512   :  { %2778 = vmatpush3.bf16.msra.mxu1 %v3143_v31 }
 0x513   :  { %2779 = vmatprep.subr.bf16.mxu1 %v3291_v49 }
 0x516   :  { %2780 = vmatpush3.bf16.msra.mxu1 %v3144_v32 }
 0x517   :  { %2781 = vmatprep.subr.bf16.mxu1 %v3291_v49 }
 0x51a   :  { %2782 = vmatpush3.bf16.msra.mxu1 %v3145_v40 }
 0x51b   :  { %2783 = vmatprep.subr.bf16.mxu1 %v3291_v49 }
 0x51e   :  { %2784 = vmatpush3.bf16.msra.mxu1 %v3146_v41 }
 0x51f   :  { %2809 = vmatprep.subr.bf16.mxu1 %v3291_v49 }
 0x5d4   :  { %v1884_v33 = vpop.f32.mrb[16].mxu1 }
 0x5d5   :  { %v1885_v34 = vadd.f32 %v2555_v20, %v1884_v33  ;;  %v2747_v35 = vpop.f32.mrb[17].mxu1 }
 0x5d6   :  { %v1887_v36 = vpop.f32.mrb[18].mxu1 }
 0x5d7   :  { %v1890_v37 = vmax.f32 %v1885_v34, 0.0  ;;  %v2748_v38 = vpop.f32.mrb[19].mxu1 }
 0x5d9   :  { %v1910_v39 = vpack.c.bf16 %v1890_v37, %v1890_v37 }
 0x5db   :  { %2766 = vmatmul.mubr.bf16.vlgmr.msra.gmra.mrb[16].mxu0 %v1910_v39 }
 0x5dc   :  { %2805 = vmatprep.mubr.msk.bf16.mxu0 %vm3292_vm0, %v3291_v49  ;;  %2790 = vmatpush3.bf16.msra.mxu0 %v3147_v42 }
 0x5dd   :  { %2791 = vmatprep.subr.bf16.mxu0 %v3291_v49 }
 0x5e0   :  { %2792 = vmatpush3.bf16.msra.mxu0 %v3148_v43 }
 0x5e1   :  { %2793 = vmatprep.subr.bf16.mxu0 %v3291_v49 }
 0x5e4   :  { %2794 = vmatpush3.bf16.msra.mxu0 %v3149_v44 }
 0x5e5   :  { %2795 = vmatprep.subr.bf16.mxu0 %v3291_v49 }
 0x5e8   :  { %2796 = vmatpush3.bf16.msra.mxu0 %v3150_v45 }
 0x5e9   :  { %2797 = vmatprep.subr.bf16.mxu0 %v3291_v49 }
 0x5ec   :  { %2798 = vmatpush3.bf16.msra.mxu0 %v3151_v46 }
 0x5ed   :  { %2799 = vmatprep.subr.bf16.mxu0 %v3291_v49 }
 0x5f0   :  { %2800 = vmatpush3.bf16.msra.mxu0 %v3152_v47 }
 0x5f1   :  { %2801 = vmatprep.subr.bf16.mxu0 %v3291_v49 }
 0x5f4   :  { %2802 = vmatpush3.bf16.msra.mxu0 %v3153_v57 }
 0x5f5   :  { %2803 = vmatprep.subr.bf16.mxu0 %v3291_v49 }
 0x5f8   :  { %2804 = vmatpush3.bf16.msra.mxu0 %v3154_v58 }
 0x6ae   :  { %v1999_v50 = vpop.f32.mrb[16].mxu0 }
 0x6af   :  { %v2000_v51 = vadd.f32 %v2565_v48, %v1999_v50  ;;  %v2767_v52 = vpop.f32.mrb[17].mxu0 }
 0x6b0   :  { %v2002_v53 = vpop.f32.mrb[18].mxu0 }
 0x6b1   :  { %v2005_v54 = vmax.f32 %v2000_v51, 0.0  ;;  %v2768_v55 = vpop.f32.mrb[19].mxu0 }
 0x6b3   :  { %v2025_v56 = vpack.c.bf16 %v2005_v54, %v2005_v54 }
 0x6b5   :  { %2786 = vmatmul.mubr.bf16.vlgmr.msra.gmra.mrb[20].mxu1 %v2025_v56 }
 0x6b6   :  { %2825 = vmatprep.mubr.msk.bf16.mxu1 %vm3292_vm0, %v3291_v49  ;;  %2810 = vmatpush3.bf16.msra.mxu1 %v3155_v59 }
 0x6b7   :  { %2811 = vmatprep.subr.bf16.mxu1 %v3291_v49 }
 0x6ba   :  { %2812 = vmatpush3.bf16.msra.mxu1 %v3156_v60 }
 0x6bb   :  { %2813 = vmatprep.subr.bf16.mxu1 %v3291_v49 }
 0x6be   :  { %2814 = vmatpush3.bf16.msra.mxu1 %v3157_v61 }
 0x6bf   :  { %2815 = vmatprep.subr.bf16.mxu1 %v3291_v49 }
 0x6c2   :  { %2816 = vmatpush3.bf16.msra.mxu1 %v3158_v62 }
 0x6c3   :  { %2817 = vmatprep.subr.bf16.mxu1 %v3291_v49 }
 0x6c6   :  { %2818 = vmatpush3.bf16.msra.mxu1 %v3159_v63 }
 0x6c7   :  { %2819 = vmatprep.subr.bf16.mxu1 %v3291_v49 }
 0x6ca   :  { %2820 = vmatpush3.bf16.msra.mxu1 %v3160_v0 }
 0x6cb   :  { %2821 = vmatprep.subr.bf16.mxu1 %v3291_v49 }
 0x6ce   :  { %2822 = vmatpush3.bf16.msra.mxu1 %v3161_v9 }
 0x6cf   :  { %2823 = vmatprep.subr.bf16.mxu1 %v3291_v49 }
 0x6d2   :  { %2824 = vmatpush3.bf16.msra.mxu1 %v3162_v10 }
 0x788   :  { %v2114_v2 = vpop.f32.mrb[20].mxu1 }
 0x789   :  { %v2115_v3 = vadd.f32 %v2575_v1, %v2114_v2  ;;  %v2787_v4 = vpop.f32.mrb[21].mxu1 }
 0x78a   :  { %v2117_v5 = vpop.f32.mrb[22].mxu1 }
 0x78b   :  { %v2120_v6 = vmax.f32 %v2115_v3, 0.0  ;;  %v2788_v7 = vpop.f32.mrb[23].mxu1 }
 0x78d   :  { %v2140_v8 = vpack.c.bf16 %v2120_v6, %v2120_v6 }
 0x78f   :  { %2806 = vmatmul.mubr.bf16.vlgmr.msra.gmra.mrb[20].mxu0 %v2140_v8 }
 0x862   :  { %v2229_v12 = vpop.f32.mrb[20].mxu0 }
 0x863   :  { %v2230_v13 = vadd.f32 %v2585_v11, %v2229_v12  ;;  %v2807_v14 = vpop.f32.mrb[21].mxu0 }
 0x864   :  { %v2232_v15 = vpop.f32.mrb[22].mxu0 }
 0x865   :  { %v2235_v16 = vmax.f32 %v2230_v13, 0.0  ;;  %v2808_v17 = vpop.f32.mrb[23].mxu0 }
 0x867   :  { %v2253_v18 = vpack.c.bf16 %v2235_v16, %v2235_v16 }
 0x869   :  { %2826 = vmatmul.mubr.bf16.vlgmr.msra.gmra.mrb[24].mxu1 %v2253_v18 }
 0x93c   :  { %v2344_v21 = vpop.f32.mrb[24].mxu1 }
 0x93d   :  { %v2345_v49 = vadd.f32 %v2595_v19, %v2344_v21  ;;  %v2827_v22 = vpop.f32.mrb[25].mxu1 }
 0x93e   :  { %v2347_v23 = vpop.f32.mrb[26].mxu1 }
 0x93f   :  { %v2350_v24 = vmax.f32 %v2345_v49, 0.0  ;;  %v2828_v25 = vpop.f32.mrb[27].mxu1 }
 0x941   :  { %v2351_v26 = vmin.f32 %v2350_v24, 1.0 }
 0x943   :  { %2352 = vst [vmem:[%s3527_s9] sm:$0xff] %v2351_v26 }
 0x944   :  { %2357 = vsyncpa [#allocation3], 1 }
 0x945   :  { %2358 = vsyncpa [#allocation5], 1 }
 0x946   :  { %2359 = vsyncpa [#allocation8], 1 }

</bundles_post_ra>
